<compile_context>
chip_gen: v7x
topology: tpu7x:2x2x1
jax: 0.10.0
libtpu: 0.0.40
codegen_flags: <defaults>
</compile_context>

<pallas_src>
import functools

import jax
import jax.numpy as jnp
from jax.experimental import pallas as pl
from jax.experimental.pallas import tpu as pltpu


# ---------------------------------------------------------------------------
# Fused kernel (single grid step; batch folded into the row axis).
# ---------------------------------------------------------------------------
def _fused_kernel(hidden, K,
                  x_ref, wexp_ref, wproj_ref, hid_ref, bn3s_ref,
                  sup_ref, sdn_ref, pool_ref, exp_ref, se_ref, o_ref):
    # x_ref:    (BH, W*Cin)        lane-dense input slab (also the residual)
    # wexp_ref: (W*Cin, W*hidden)  block-diagonal 1x1 expand weight (BN1 scale folded)
    # wproj_ref:(W*hidden, W*oup)  block-diagonal 1x1 project weight (BN3 scale folded)
    # hid_ref:  (K*K+2, W*hidden)  rows: BN1 shift, BN2 shift, then K*K dw taps (BN2 folded)
    # bn3s_ref: (1, W*oup)         BN3 shift
    # sup_ref/sdn_ref: (BH, BH)    vertical shift matrices (image borders = zero rows)
    # pool_ref: (SB, BH)           per-image row-mean matrix (1/(H*W) folded in)
    # exp_ref:  (BH, SB)           per-image row-broadcast matrix
    # se_ref:   (2*hidden+2, hidden) [w1 ; w2 ; b1 ; b2], zero-padded to `hidden`
    # o_ref:    (BH, W*oup)
    sixth = 1.0 / 6.0
    BH = x_ref.shape[0]
    WH = wexp_ref.shape[1]

    # ---- expand 1x1 (BN1 scale pre-folded) + BN1 shift + h_swish ------------
    x = x_ref[...]
    y = jnp.dot(x, wexp_ref[...], preferred_element_type=jnp.float32) + hid_ref[0:1, :]
    y = y * (jnp.clip(y + 3.0, 0.0, 6.0) * sixth)                      # (BH, WH)

    # ---- depthwise 3x3, register resident (no padded VMEM scratch) ----------
    # Horizontal neighbours: XLU lane rolls; the border zeros are derived from
    # the rolled lane index, which also makes the code independent of the
    # rotate-direction convention.
    lane = jax.lax.broadcasted_iota(jnp.int32, (BH, WH), 1)
    ya, ia = pltpu.roll(y, hidden, axis=1), pltpu.roll(lane, hidden, axis=1)
    yb, ib = pltpu.roll(y, WH - hidden, axis=1), pltpu.roll(lane, WH - hidden, axis=1)

    def neighbour(off):           # value at pixel (h, w+off); zero outside the row
        tgt = lane + off * hidden
        return jnp.where(ia == tgt, ya, 0.0) + jnp.where(ib == tgt, yb, 0.0)

    y_wm1 = neighbour(-1)
    y_wp1 = neighbour(+1)

    def hrow(i):                  # horizontal tap combination for kernel row i
        b = 2 + i * K
        return (y_wm1 * hid_ref[b:b + 1, :] + y * hid_ref[b + 1:b + 2, :]
                + y_wp1 * hid_ref[b + 2:b + 3, :])

    # Vertical neighbours via tiny shift matrices on the (otherwise idle) MXU;
    # per-image top/bottom borders and the batch-fold boundaries are baked in.
    acc = hrow(1)
    acc = acc + jnp.dot(sdn_ref[...], hrow(0), preferred_element_type=jnp.float32)
    acc = acc + jnp.dot(sup_ref[...], hrow(2), preferred_element_type=jnp.float32)
    v = acc + hid_ref[1:2, :]                                           # BN2 shift

    # ---- Squeeze-Excite ------------------------------------------------------
    # Per-image row mean via a tiny pooling matmul, then a log2(W) lane roll
    # tree to sum the W pixel groups (no serial chain of misaligned slices).
    red = jnp.dot(pool_ref[...], v, preferred_element_type=jnp.float32)  # (SB, WH)
    shift = WH // 2
    while shift >= hidden:
        red = red + pltpu.roll(red, shift, axis=1)
        shift //= 2
    pooled = red[:, 0:hidden]                                            # (SB, hidden)

    w1 = se_ref[0:hidden, :]
    w2 = se_ref[hidden:2 * hidden, :]
    b1 = se_ref[2 * hidden:2 * hidden + 1, :]
    b2 = se_ref[2 * hidden + 1:2 * hidden + 2, :]
    h1 = jnp.maximum(jnp.dot(pooled, w1, preferred_element_type=jnp.float32) + b1, 0.0)
    g = jnp.dot(h1, w2, preferred_element_type=jnp.float32) + b2
    g = jnp.clip(g + 3.0, 0.0, 6.0) * sixth                              # h_sigmoid gate

    # Lane-expand the gate back to (SB, WH) with the inverse roll tree, then
    # broadcast to rows per image with a tiny matmul.
    if WH > hidden:
        gf = jnp.concatenate(
            [g, jnp.zeros((g.shape[0], WH - hidden), jnp.float32)], axis=1)
        shift = hidden
        while shift < WH:
            gf = gf + pltpu.roll(gf, shift, axis=1)
            shift *= 2
    else:
        gf = g
    v = v * jnp.dot(exp_ref[...], gf, preferred_element_type=jnp.float32)

    # ---- h_swish, project 1x1 (BN3 scale pre-folded) + shift + residual ------
    v = v * (jnp.clip(v + 3.0, 0.0, 6.0) * sixth)
    out = jnp.dot(v, wproj_ref[...], preferred_element_type=jnp.float32)
    o_ref[...] = out + bn3s_ref[...] + x


# ---------------------------------------------------------------------------
# One-time parameter packing (outside the hot path).
# ---------------------------------------------------------------------------
def prepare_params(params, *, B, H, W, K):
    inp, hidden = params["w_expand"].shape
    oup = params["w_proj"].shape[1]
    se_dim = params["se_w1"].shape[1]
    BH = B * H
    SB = ((B + 7) // 8) * 8       # SE intermediates padded to a full sublane tile

    # Fold the three BN scales into the conv weights (only shifts stay as adds).
    w_exp = params["w_expand"] * params["bn1_scale"].reshape(1, hidden)
    w_proj = params["w_proj"] * params["bn3_scale"].reshape(1, oup)
    dw = params["dw_w"] * params["bn2_scale"].reshape(1, 1, hidden)

    def block_diag(w, reps):      # (cin, cout) -> (reps*cin, reps*cout)
        cin, cout = w.shape
        eye = jnp.eye(reps, dtype=w.dtype)
        return jnp.einsum("xy,io->xiyo", eye, w).reshape(reps * cin, reps * cout)

    def tile_row(row, reps):      # (c,) or (1,c) -> (1, reps*c)
        return jnp.tile(jnp.reshape(row, (1, -1)), (1, reps))

    hid_rows = [tile_row(params["bn1_shift"], W), tile_row(params["bn2_shift"], W)]
    hid_rows += [tile_row(dw[i, j], W) for i in range(K) for j in range(K)]

    # Vertical shift matrices for the depthwise conv (image borders = zero rows).
    r = jnp.arange(BH)
    s_up = ((r[None, :] == r[:, None] + 1) &
            ((r[:, None] % H) != H - 1)).astype(jnp.float32)     # out[r] += in[r+1]
    s_down = ((r[None, :] == r[:, None] - 1) &
              ((r[:, None] % H) != 0)).astype(jnp.float32)       # out[r] += in[r-1]

    # Per-image pooling / row-broadcast matrices for the SE layer.
    img = r // H
    sb = jnp.arange(SB)
    pool = jnp.where(sb[:, None] == img[None, :], 1.0 / (H * W), 0.0)   # (SB, BH)
    expand = jnp.where(img[:, None] == sb[None, :], 1.0, 0.0)           # (BH, SB)

    # SE weights + both biases packed into one operand, zero-padded to `hidden`.
    w1p = jnp.zeros((hidden, hidden), jnp.float32).at[:, :se_dim].set(params["se_w1"])
    w2p = jnp.zeros((hidden, hidden), jnp.float32).at[:se_dim, :].set(params["se_w2"])
    b1p = jnp.zeros((1, hidden), jnp.float32).at[:, :se_dim].set(
        params["se_b1"].reshape(1, se_dim))
    b2p = params["se_b2"].reshape(1, hidden)

    return {
        "w_exp_bd": block_diag(w_exp, W),                         # (W*inp, W*hidden)
        "w_proj_bd": block_diag(w_proj, W),                       # (W*hidden, W*oup)
        "hid_params": jnp.concatenate(hid_rows, axis=0),          # (K*K+2, W*hidden)
        "bn3_shift": tile_row(params["bn3_shift"], W),            # (1, W*oup)
        "s_up": s_up, "s_down": s_down,                           # (BH, BH)
        "pool": pool, "expand": expand,                           # (SB, BH), (BH, SB)
        "se_pack": jnp.concatenate([w1p, w2p, b1p, b2p], axis=0), # (2*hidden+2, hidden)
    }


# ---------------------------------------------------------------------------
# Wrapper
# ---------------------------------------------------------------------------
@jax.jit
def inverted_residual(x, prep):
    # x: NHWC (B, H, W, Cin); returns NHWC (B, H, W, oup)
    B, H, W, Cin = x.shape
    WH = prep["hid_params"].shape[1]
    hidden = prep["se_pack"].shape[1]
    WO = prep["w_proj_bd"].shape[1]
    oup = WO // W
    K = int(round((prep["hid_params"].shape[0] - 2) ** 0.5))
    assert K == 3, "kernel is written for the 3x3 depthwise case"
    assert Cin == oup, "identity-residual branch requires inp == oup"
    BH, WC = B * H, W * Cin
    SB = prep["pool"].shape[0]

    x_slab = x.reshape(BH, WC)   # lane-dense slab, batch folded into the row axis

    out = pl.pallas_call(
        functools.partial(_fused_kernel, hidden, K),
        out_shape=jax.ShapeDtypeStruct((BH, WO), jnp.float32),
        grid=(1,),
        in_specs=[
            pl.BlockSpec((BH, WC), lambda i: (0, 0)),                  # x slab (residual)
            pl.BlockSpec((WC, WH), lambda i: (0, 0)),                  # expand weight
            pl.BlockSpec((WH, WO), lambda i: (0, 0)),                  # project weight
            pl.BlockSpec((K * K + 2, WH), lambda i: (0, 0)),           # BN shifts + dw taps
            pl.BlockSpec((1, WO), lambda i: (0, 0)),                   # BN3 shift
            pl.BlockSpec((BH, BH), lambda i: (0, 0)),                  # S_up
            pl.BlockSpec((BH, BH), lambda i: (0, 0)),                  # S_down
            pl.BlockSpec((SB, BH), lambda i: (0, 0)),                  # SE pooling matrix
            pl.BlockSpec((BH, SB), lambda i: (0, 0)),                  # SE row-broadcast matrix
            pl.BlockSpec((2 * hidden + 2, hidden), lambda i: (0, 0)),  # SE weights + biases
        ],
        out_specs=pl.BlockSpec((BH, WO), lambda i: (0, 0)),
        compiler_params=pltpu.CompilerParams(
            dimension_semantics=("arbitrary",),
            vmem_limit_bytes=32 * 1024 * 1024),
    )(x_slab, prep["w_exp_bd"], prep["w_proj_bd"], prep["hid_params"],
      prep["bn3_shift"], prep["s_up"], prep["s_down"],
      prep["pool"], prep["expand"], prep["se_pack"])

    return out.reshape(B, H, W, oup)


# ---------------------------------------------------------------------------
# Pure-JAX reference (same math, no Pallas)
# ---------------------------------------------------------------------------
def reference(x, params, K=3):
    B, H, W, Cin = x.shape
    p = (K - 1) // 2
    h = jnp.einsum("bhwc,cd->bhwd", x, params["w_expand"])
    h = h * params["bn1_scale"][0] + params["bn1_shift"][0]
    h = h * jnp.clip(h + 3.0, 0.0, 6.0) / 6.0
    hp = jnp.pad(h, ((0, 0), (p, p), (p, p), (0, 0)))
    acc = jnp.zeros_like(h)
    for i in range(K):
        for j in range(K):
            acc = acc + hp[:, i:i + H, j:j + W, :] * params["dw_w"][i, j, :]
    v = acc * params["bn2_scale"][0] + params["bn2_shift"][0]
    pooled = v.mean(axis=(1, 2))
    h1 = jnp.maximum(pooled @ params["se_w1"] + params["se_b1"][0], 0.0)
    h2 = h1 @ params["se_w2"] + params["se_b2"][0]
    gate = jnp.clip(h2 + 3.0, 0.0, 6.0) / 6.0
    v = v * gate[:, None, None, :]
    v = v * jnp.clip(v + 3.0, 0.0, 6.0) / 6.0
    out = jnp.einsum("bhwc,cd->bhwd", v, params["w_proj"])
    out = out * params["bn3_scale"][0] + params["bn3_shift"][0]
    return out + x


def _make_divisible(v, divisor, min_value=None):
    if min_value is None:
        min_value = divisor
    new_v = max(min_value, int(v + divisor / 2) // divisor * divisor)
    if new_v < 0.9 * v:
        new_v += divisor
    return new_v


def fold_bn(key, c, eps=1e-5):
    k1, k2, k3, k4 = jax.random.split(key, 4)
    gamma = 1.0 + 0.1 * jax.random.normal(k1, (c,), jnp.float32)
    beta = 0.1 * jax.random.normal(k2, (c,), jnp.float32)
    mean = 0.1 * jax.random.normal(k3, (c,), jnp.float32)
    var = jnp.abs(1.0 + 0.1 * jax.random.normal(k4, (c,), jnp.float32))
    scale = gamma / jnp.sqrt(var + eps)
    shift = beta - mean * scale
    return scale.reshape(1, c), shift.reshape(1, c)


if __name__ == "__main__":
    # InvertedResidual(inp=8, hidden_dim=32, oup=8, kernel_size=3, stride=1,
    #                  use_se=True, use_hs=True)   (expand branch, identity residual)
    B, H, W = 2, 16, 16
    inp, hidden, oup, K = 8, 32, 8, 3
    se_dim = _make_divisible(hidden // 4, 8)    # = 8

    key = jax.random.PRNGKey(0)
    ks = jax.random.split(key, 12)

    params = {
        "w_expand": 0.2 * jax.random.normal(ks[0], (inp, hidden), jnp.float32),
        "dw_w":     0.2 * jax.random.normal(ks[1], (K, K, hidden), jnp.float32),
        "w_proj":   0.2 * jax.random.normal(ks[2], (hidden, oup), jnp.float32),
        "se_w1":    0.2 * jax.random.normal(ks[3], (hidden, se_dim), jnp.float32),
        "se_b1":    0.1 * jax.random.normal(ks[4], (1, se_dim), jnp.float32),
        "se_w2":    0.2 * jax.random.normal(ks[5], (se_dim, hidden), jnp.float32),
        "se_b2":    0.1 * jax.random.normal(ks[6], (1, hidden), jnp.float32),
    }
    params["bn1_scale"], params["bn1_shift"] = fold_bn(ks[7], hidden)
    params["bn2_scale"], params["bn2_shift"] = fold_bn(ks[8], hidden)
    params["bn3_scale"], params["bn3_shift"] = fold_bn(ks[9], oup)

    # layout: NHWC input (PyTorch equivalent would be NCHW (2, 8, 16, 16))
    x = jax.random.normal(ks[10], (B, H, W, inp), jnp.float32)

    prep = prepare_params(params, B=B, H=H, W=W, K=K)   # one-time packing / BN folding
    out = inverted_residual(x, prep)
    out = jax.block_until_ready(out)

    ref = reference(x, params, K=K)
    assert out.shape == (B, H, W, oup), out.shape
    assert jnp.allclose(out, ref, atol=1e-4, rtol=1e-4), \
        float(jnp.max(jnp.abs(out - ref)))

    print("KERNEL_OK")
</pallas_src>

<mosaic_0001>
module attributes {stable_mosaic.version = 11 : i64} {
  func.func @_fused_kernel(%arg0: i32, %arg1: memref<32x128xf32, #tpu.memory_space<vmem>>, %arg2: memref<128x512xf32, #tpu.memory_space<vmem>>, %arg3: memref<512x128xf32, #tpu.memory_space<vmem>>, %arg4: memref<11x512xf32, #tpu.memory_space<vmem>>, %arg5: memref<1x128xf32, #tpu.memory_space<vmem>>, %arg6: memref<32x32xf32, #tpu.memory_space<vmem>>, %arg7: memref<32x32xf32, #tpu.memory_space<vmem>>, %arg8: memref<8x32xf32, #tpu.memory_space<vmem>>, %arg9: memref<32x8xf32, #tpu.memory_space<vmem>>, %arg10: memref<66x32xf32, #tpu.memory_space<vmem>>, %arg11: memref<32x128xf32, #tpu.memory_space<vmem>>) attributes {dimension_semantics = [#tpu.dimension_semantics<arbitrary>], iteration_bounds = array<i64: 1>, scalar_prefetch = 0 : i64, scratch_operands = 0 : i64, tpu.core_type = #tpu.core_type<tc>, window_params = [{pipeline_mode = #tpu.pipeline_mode<synchronous>, transform_indices = @transform_0, window_bounds = array<i64: 32, 128>}, {pipeline_mode = #tpu.pipeline_mode<synchronous>, transform_indices = @transform_1, window_bounds = array<i64: 128, 512>}, {pipeline_mode = #tpu.pipeline_mode<synchronous>, transform_indices = @transform_2, window_bounds = array<i64: 512, 128>}, {pipeline_mode = #tpu.pipeline_mode<synchronous>, transform_indices = @transform_3, window_bounds = array<i64: 11, 512>}, {pipeline_mode = #tpu.pipeline_mode<synchronous>, transform_indices = @transform_4, window_bounds = array<i64: 1, 128>}, {pipeline_mode = #tpu.pipeline_mode<synchronous>, transform_indices = @transform_5, window_bounds = array<i64: 32, 32>}, {pipeline_mode = #tpu.pipeline_mode<synchronous>, transform_indices = @transform_6, window_bounds = array<i64: 32, 32>}, {pipeline_mode = #tpu.pipeline_mode<synchronous>, transform_indices = @transform_7, window_bounds = array<i64: 8, 32>}, {pipeline_mode = #tpu.pipeline_mode<synchronous>, transform_indices = @transform_8, window_bounds = array<i64: 32, 8>}, {pipeline_mode = #tpu.pipeline_mode<synchronous>, transform_indices = @transform_9, window_bounds = array<i64: 66, 32>}, {pipeline_mode = #tpu.pipeline_mode<synchronous>, transform_indices = @transform_10, window_bounds = array<i64: 32, 128>}]} {
    %c0 = arith.constant 0 : index
    %c0_0 = arith.constant 0 : index
    %0 = vector.load %arg1[%c0, %c0_0] : memref<32x128xf32, #tpu.memory_space<vmem>>, vector<32x128xf32>
    %c0_1 = arith.constant 0 : index
    %c0_2 = arith.constant 0 : index
    %1 = vector.load %arg2[%c0_1, %c0_2] : memref<128x512xf32, #tpu.memory_space<vmem>>, vector<128x512xf32>
    %cst = arith.constant dense<0.000000e+00> : vector<32x512xf32>
    %2 = tpu.matmul %0, %1, %cst {dimension_numbers = #tpu.dot_dimension_numbers<[1], [0], [0], [1], [0, 0, 1, 1], [], []>} : vector<32x128xf32>, vector<128x512xf32>, vector<32x512xf32> -> vector<32x512xf32>
    %c0_3 = arith.constant 0 : index
    %c0_4 = arith.constant 0 : index
    %3 = vector.load %arg4[%c0_3, %c0_4] : memref<11x512xf32, #tpu.memory_space<vmem>>, vector<1x512xf32>
    %4 = vector.broadcast %3 : vector<1x512xf32> to vector<32x512xf32>
    %5 = arith.addf %2, %4 : vector<32x512xf32>
    %cst_5 = arith.constant 3.000000e+00 : f32
    %6 = vector.broadcast %cst_5 : f32 to vector<32x512xf32>
    %7 = arith.addf %5, %6 : vector<32x512xf32>
    %cst_6 = arith.constant 0.000000e+00 : f32
    %cst_7 = arith.constant 6.000000e+00 : f32
    %8 = vector.broadcast %cst_6 : f32 to vector<32x512xf32>
    %9 = arith.maximumf %8, %7 : vector<32x512xf32>
    %10 = vector.broadcast %cst_7 : f32 to vector<32x512xf32>
    %11 = arith.minimumf %10, %9 : vector<32x512xf32>
    %cst_8 = arith.constant 0.166666672 : f32
    %12 = vector.broadcast %cst_8 : f32 to vector<32x512xf32>
    %13 = arith.mulf %11, %12 : vector<32x512xf32>
    %14 = arith.mulf %5, %13 : vector<32x512xf32>
    %15 = tpu.iota {dimensions = array<i32: 1>} : vector<32x512xi32>
    %c32_i32 = arith.constant 32 : i32
    %16 = tpu.dynamic_rotate %14 by %c32_i32 dim 1 : vector<32x512xf32>, i32 -> vector<32x512xf32>
    %c32_i32_9 = arith.constant 32 : i32
    %17 = tpu.dynamic_rotate %15 by %c32_i32_9 dim 1 : vector<32x512xi32>, i32 -> vector<32x512xi32>
    %c480_i32 = arith.constant 480 : i32
    %18 = tpu.dynamic_rotate %14 by %c480_i32 dim 1 : vector<32x512xf32>, i32 -> vector<32x512xf32>
    %c480_i32_10 = arith.constant 480 : i32
    %19 = tpu.dynamic_rotate %15 by %c480_i32_10 dim 1 : vector<32x512xi32>, i32 -> vector<32x512xi32>
    %c-32_i32 = arith.constant -32 : i32
    %20 = vector.broadcast %c-32_i32 : i32 to vector<32x512xi32>
    %21 = arith.addi %15, %20 : vector<32x512xi32>
    %22 = arith.cmpi eq, %17, %21 : vector<32x512xi32>
    %cst_11 = arith.constant 0.000000e+00 : f32
    %23 = vector.broadcast %cst_11 : f32 to vector<32x512xf32>
    %24 = arith.select %22, %16, %23 : vector<32x512xi1>, vector<32x512xf32>
    %25 = arith.cmpi eq, %19, %21 : vector<32x512xi32>
    %cst_12 = arith.constant 0.000000e+00 : f32
    %26 = vector.broadcast %cst_12 : f32 to vector<32x512xf32>
    %27 = arith.select %25, %18, %26 : vector<32x512xi1>, vector<32x512xf32>
    %28 = arith.addf %24, %27 : vector<32x512xf32>
    %c32_i32_13 = arith.constant 32 : i32
    %29 = vector.broadcast %c32_i32_13 : i32 to vector<32x512xi32>
    %30 = arith.addi %15, %29 : vector<32x512xi32>
    %31 = arith.cmpi eq, %17, %30 : vector<32x512xi32>
    %cst_14 = arith.constant 0.000000e+00 : f32
    %32 = vector.broadcast %cst_14 : f32 to vector<32x512xf32>
    %33 = arith.select %31, %16, %32 : vector<32x512xi1>, vector<32x512xf32>
    %34 = arith.cmpi eq, %19, %30 : vector<32x512xi32>
    %cst_15 = arith.constant 0.000000e+00 : f32
    %35 = vector.broadcast %cst_15 : f32 to vector<32x512xf32>
    %36 = arith.select %34, %18, %35 : vector<32x512xi1>, vector<32x512xf32>
    %37 = arith.addf %33, %36 : vector<32x512xf32>
    %c5 = arith.constant 5 : index
    %c0_16 = arith.constant 0 : index
    %38 = vector.load %arg4[%c5, %c0_16] : memref<11x512xf32, #tpu.memory_space<vmem>>, vector<1x512xf32>
    %39 = vector.broadcast %38 : vector<1x512xf32> to vector<32x512xf32>
    %40 = arith.mulf %28, %39 : vector<32x512xf32>
    %c6 = arith.constant 6 : index
    %c0_17 = arith.constant 0 : index
    %41 = vector.load %arg4[%c6, %c0_17] : memref<11x512xf32, #tpu.memory_space<vmem>>, vector<1x512xf32>
    %42 = vector.broadcast %41 : vector<1x512xf32> to vector<32x512xf32>
    %43 = arith.mulf %14, %42 : vector<32x512xf32>
    %44 = arith.addf %40, %43 : vector<32x512xf32>
    %c7 = arith.constant 7 : index
    %c0_18 = arith.constant 0 : index
    %45 = vector.load %arg4[%c7, %c0_18] : memref<11x512xf32, #tpu.memory_space<vmem>>, vector<1x512xf32>
    %46 = vector.broadcast %45 : vector<1x512xf32> to vector<32x512xf32>
    %47 = arith.mulf %37, %46 : vector<32x512xf32>
    %48 = arith.addf %44, %47 : vector<32x512xf32>
    %c0_19 = arith.constant 0 : index
    %c0_20 = arith.constant 0 : index
    %49 = vector.load %arg7[%c0_19, %c0_20] : memref<32x32xf32, #tpu.memory_space<vmem>>, vector<32x32xf32>
    %c2 = arith.constant 2 : index
    %c0_21 = arith.constant 0 : index
    %50 = vector.load %arg4[%c2, %c0_21] : memref<11x512xf32, #tpu.memory_space<vmem>>, vector<1x512xf32>
    %51 = vector.broadcast %50 : vector<1x512xf32> to vector<32x512xf32>
    %52 = arith.mulf %28, %51 : vector<32x512xf32>
    %c3 = arith.constant 3 : index
    %c0_22 = arith.constant 0 : index
    %53 = vector.load %arg4[%c3, %c0_22] : memref<11x512xf32, #tpu.memory_space<vmem>>, vector<1x512xf32>
    %54 = vector.broadcast %53 : vector<1x512xf32> to vector<32x512xf32>
    %55 = arith.mulf %14, %54 : vector<32x512xf32>
    %56 = arith.addf %52, %55 : vector<32x512xf32>
    %c4 = arith.constant 4 : index
    %c0_23 = arith.constant 0 : index
    %57 = vector.load %arg4[%c4, %c0_23] : memref<11x512xf32, #tpu.memory_space<vmem>>, vector<1x512xf32>
    %58 = vector.broadcast %57 : vector<1x512xf32> to vector<32x512xf32>
    %59 = arith.mulf %37, %58 : vector<32x512xf32>
    %60 = arith.addf %56, %59 : vector<32x512xf32>
    %cst_24 = arith.constant dense<0.000000e+00> : vector<32x512xf32>
    %61 = tpu.matmul %49, %60, %cst_24 {dimension_numbers = #tpu.dot_dimension_numbers<[1], [0], [0], [1], [0, 0, 1, 1], [], []>} : vector<32x32xf32>, vector<32x512xf32>, vector<32x512xf32> -> vector<32x512xf32>
    %62 = arith.addf %48, %61 : vector<32x512xf32>
    %c0_25 = arith.constant 0 : index
    %c0_26 = arith.constant 0 : index
    %63 = vector.load %arg6[%c0_25, %c0_26] : memref<32x32xf32, #tpu.memory_space<vmem>>, vector<32x32xf32>
    %c8 = arith.constant 8 : index
    %c0_27 = arith.constant 0 : index
    %64 = vector.load %arg4[%c8, %c0_27] : memref<11x512xf32, #tpu.memory_space<vmem>>, vector<1x512xf32>
    %65 = vector.broadcast %64 : vector<1x512xf32> to vector<32x512xf32>
    %66 = arith.mulf %28, %65 : vector<32x512xf32>
    %c9 = arith.constant 9 : index
    %c0_28 = arith.constant 0 : index
    %67 = vector.load %arg4[%c9, %c0_28] : memref<11x512xf32, #tpu.memory_space<vmem>>, vector<1x512xf32>
    %68 = vector.broadcast %67 : vector<1x512xf32> to vector<32x512xf32>
    %69 = arith.mulf %14, %68 : vector<32x512xf32>
    %70 = arith.addf %66, %69 : vector<32x512xf32>
    %c10 = arith.constant 10 : index
    %c0_29 = arith.constant 0 : index
    %71 = vector.load %arg4[%c10, %c0_29] : memref<11x512xf32, #tpu.memory_space<vmem>>, vector<1x512xf32>
    %72 = vector.broadcast %71 : vector<1x512xf32> to vector<32x512xf32>
    %73 = arith.mulf %37, %72 : vector<32x512xf32>
    %74 = arith.addf %70, %73 : vector<32x512xf32>
    %cst_30 = arith.constant dense<0.000000e+00> : vector<32x512xf32>
    %75 = tpu.matmul %63, %74, %cst_30 {dimension_numbers = #tpu.dot_dimension_numbers<[1], [0], [0], [1], [0, 0, 1, 1], [], []>} : vector<32x32xf32>, vector<32x512xf32>, vector<32x512xf32> -> vector<32x512xf32>
    %76 = arith.addf %62, %75 : vector<32x512xf32>
    %c1 = arith.constant 1 : index
    %c0_31 = arith.constant 0 : index
    %77 = vector.load %arg4[%c1, %c0_31] : memref<11x512xf32, #tpu.memory_space<vmem>>, vector<1x512xf32>
    %78 = vector.broadcast %77 : vector<1x512xf32> to vector<32x512xf32>
    %79 = arith.addf %76, %78 : vector<32x512xf32>
    %c0_32 = arith.constant 0 : index
    %c0_33 = arith.constant 0 : index
    %80 = vector.load %arg8[%c0_32, %c0_33] : memref<8x32xf32, #tpu.memory_space<vmem>>, vector<8x32xf32>
    %81 = vector.shape_cast %80 : vector<8x32xf32> to vector<8x32xf32>
    %cst_34 = arith.constant dense<0.000000e+00> : vector<8x512xf32>
    %82 = tpu.matmul %81, %79, %cst_34 {dimension_numbers = #tpu.dot_dimension_numbers<[1], [0], [0], [1], [0, 0, 1, 1], [], []>} : vector<8x32xf32>, vector<32x512xf32>, vector<8x512xf32> -> vector<8x512xf32>
    %c256_i32 = arith.constant 256 : i32
    %83 = tpu.dynamic_rotate %82 by %c256_i32 dim 1 : vector<8x512xf32>, i32 -> vector<8x512xf32>
    %84 = arith.addf %82, %83 : vector<8x512xf32>
    %c128_i32 = arith.constant 128 : i32
    %85 = tpu.dynamic_rotate %84 by %c128_i32 dim 1 : vector<8x512xf32>, i32 -> vector<8x512xf32>
    %86 = arith.addf %84, %85 : vector<8x512xf32>
    %c64_i32 = arith.constant 64 : i32
    %87 = tpu.dynamic_rotate %86 by %c64_i32 dim 1 : vector<8x512xf32>, i32 -> vector<8x512xf32>
    %88 = arith.addf %86, %87 : vector<8x512xf32>
    %c32_i32_35 = arith.constant 32 : i32
    %89 = tpu.dynamic_rotate %88 by %c32_i32_35 dim 1 : vector<8x512xf32>, i32 -> vector<8x512xf32>
    %90 = arith.addf %88, %89 : vector<8x512xf32>
    %91 = vector.extract_strided_slice %90 {offsets = [0, 0], sizes = [8, 32], strides = [1, 1]} : vector<8x512xf32> to vector<8x32xf32>
    %c0_36 = arith.constant 0 : index
    %c0_37 = arith.constant 0 : index
    %92 = vector.load %arg10[%c0_36, %c0_37] : memref<66x32xf32, #tpu.memory_space<vmem>>, vector<32x32xf32>
    %c32 = arith.constant 32 : index
    %c0_38 = arith.constant 0 : index
    %93 = vector.load %arg10[%c32, %c0_38] : memref<66x32xf32, #tpu.memory_space<vmem>>, vector<32x32xf32>
    %c64 = arith.constant 64 : index
    %c0_39 = arith.constant 0 : index
    %94 = vector.load %arg10[%c64, %c0_39] : memref<66x32xf32, #tpu.memory_space<vmem>>, vector<1x32xf32>
    %c65 = arith.constant 65 : index
    %c0_40 = arith.constant 0 : index
    %95 = vector.load %arg10[%c65, %c0_40] : memref<66x32xf32, #tpu.memory_space<vmem>>, vector<1x32xf32>
    %cst_41 = arith.constant dense<0.000000e+00> : vector<8x32xf32>
    %96 = tpu.matmul %91, %92, %cst_41 {dimension_numbers = #tpu.dot_dimension_numbers<[1], [0], [0], [1], [0, 0, 1, 1], [], []>} : vector<8x32xf32>, vector<32x32xf32>, vector<8x32xf32> -> vector<8x32xf32>
    %97 = vector.broadcast %94 : vector<1x32xf32> to vector<8x32xf32>
    %98 = arith.addf %96, %97 : vector<8x32xf32>
    %cst_42 = arith.constant 0.000000e+00 : f32
    %99 = vector.broadcast %cst_42 : f32 to vector<8x32xf32>
    %100 = arith.maximumf %98, %99 : vector<8x32xf32>
    %cst_43 = arith.constant dense<0.000000e+00> : vector<8x32xf32>
    %101 = tpu.matmul %100, %93, %cst_43 {dimension_numbers = #tpu.dot_dimension_numbers<[1], [0], [0], [1], [0, 0, 1, 1], [], []>} : vector<8x32xf32>, vector<32x32xf32>, vector<8x32xf32> -> vector<8x32xf32>
    %102 = vector.broadcast %95 : vector<1x32xf32> to vector<8x32xf32>
    %103 = arith.addf %101, %102 : vector<8x32xf32>
    %cst_44 = arith.constant 3.000000e+00 : f32
    %104 = vector.broadcast %cst_44 : f32 to vector<8x32xf32>
    %105 = arith.addf %103, %104 : vector<8x32xf32>
    %cst_45 = arith.constant 0.000000e+00 : f32
    %cst_46 = arith.constant 6.000000e+00 : f32
    %106 = vector.broadcast %cst_45 : f32 to vector<8x32xf32>
    %107 = arith.maximumf %106, %105 : vector<8x32xf32>
    %108 = vector.broadcast %cst_46 : f32 to vector<8x32xf32>
    %109 = arith.minimumf %108, %107 : vector<8x32xf32>
    %cst_47 = arith.constant 0.166666672 : f32
    %110 = vector.broadcast %cst_47 : f32 to vector<8x32xf32>
    %111 = arith.mulf %109, %110 : vector<8x32xf32>
    %cst_48 = arith.constant 0.000000e+00 : f32
    %112 = vector.broadcast %cst_48 : f32 to vector<8x480xf32>
    %113 = tpu.concatenate %111, %112 in 1 : vector<8x32xf32>, vector<8x480xf32> -> vector<8x512xf32>
    %c32_i32_49 = arith.constant 32 : i32
    %114 = tpu.dynamic_rotate %113 by %c32_i32_49 dim 1 : vector<8x512xf32>, i32 -> vector<8x512xf32>
    %115 = arith.addf %113, %114 : vector<8x512xf32>
    %c64_i32_50 = arith.constant 64 : i32
    %116 = tpu.dynamic_rotate %115 by %c64_i32_50 dim 1 : vector<8x512xf32>, i32 -> vector<8x512xf32>
    %117 = arith.addf %115, %116 : vector<8x512xf32>
    %c128_i32_51 = arith.constant 128 : i32
    %118 = tpu.dynamic_rotate %117 by %c128_i32_51 dim 1 : vector<8x512xf32>, i32 -> vector<8x512xf32>
    %119 = arith.addf %117, %118 : vector<8x512xf32>
    %c256_i32_52 = arith.constant 256 : i32
    %120 = tpu.dynamic_rotate %119 by %c256_i32_52 dim 1 : vector<8x512xf32>, i32 -> vector<8x512xf32>
    %121 = arith.addf %119, %120 : vector<8x512xf32>
    %c0_53 = arith.constant 0 : index
    %c0_54 = arith.constant 0 : index
    %122 = vector.load %arg9[%c0_53, %c0_54] : memref<32x8xf32, #tpu.memory_space<vmem>>, vector<32x8xf32>
    %123 = vector.shape_cast %122 : vector<32x8xf32> to vector<32x8xf32>
    %cst_55 = arith.constant dense<0.000000e+00> : vector<32x512xf32>
    %124 = tpu.matmul %123, %121, %cst_55 {dimension_numbers = #tpu.dot_dimension_numbers<[1], [0], [0], [1], [0, 0, 1, 1], [], []>} : vector<32x8xf32>, vector<8x512xf32>, vector<32x512xf32> -> vector<32x512xf32>
    %125 = arith.mulf %79, %124 : vector<32x512xf32>
    %cst_56 = arith.constant 3.000000e+00 : f32
    %126 = vector.broadcast %cst_56 : f32 to vector<32x512xf32>
    %127 = arith.addf %125, %126 : vector<32x512xf32>
    %cst_57 = arith.constant 0.000000e+00 : f32
    %cst_58 = arith.constant 6.000000e+00 : f32
    %128 = vector.broadcast %cst_57 : f32 to vector<32x512xf32>
    %129 = arith.maximumf %128, %127 : vector<32x512xf32>
    %130 = vector.broadcast %cst_58 : f32 to vector<32x512xf32>
    %131 = arith.minimumf %130, %129 : vector<32x512xf32>
    %cst_59 = arith.constant 0.166666672 : f32
    %132 = vector.broadcast %cst_59 : f32 to vector<32x512xf32>
    %133 = arith.mulf %131, %132 : vector<32x512xf32>
    %134 = arith.mulf %125, %133 : vector<32x512xf32>
    %c0_60 = arith.constant 0 : index
    %c0_61 = arith.constant 0 : index
    %135 = vector.load %arg3[%c0_60, %c0_61] : memref<512x128xf32, #tpu.memory_space<vmem>>, vector<512x128xf32>
    %cst_62 = arith.constant dense<0.000000e+00> : vector<32x128xf32>
    %136 = tpu.matmul %134, %135, %cst_62 {dimension_numbers = #tpu.dot_dimension_numbers<[1], [0], [0], [1], [0, 0, 1, 1], [], []>} : vector<32x512xf32>, vector<512x128xf32>, vector<32x128xf32> -> vector<32x128xf32>
    %c0_63 = arith.constant 0 : index
    %c0_64 = arith.constant 0 : index
    %137 = vector.load %arg5[%c0_63, %c0_64] : memref<1x128xf32, #tpu.memory_space<vmem>>, vector<1x128xf32>
    %138 = vector.broadcast %137 : vector<1x128xf32> to vector<32x128xf32>
    %139 = arith.addf %136, %138 : vector<32x128xf32>
    %140 = arith.addf %139, %0 : vector<32x128xf32>
    %c0_65 = arith.constant 0 : index
    %c0_66 = arith.constant 0 : index
    %141 = vector.load %arg11[%c0_65, %c0_66] : memref<32x128xf32, #tpu.memory_space<vmem>>, vector<32x128xf32>
    tpu.vector_store %arg11[%c0_65, %c0_66], %140 {strides = array<i32>} : memref<32x128xf32, #tpu.memory_space<vmem>>, vector<32x128xf32>,
    return
  }
  func.func @transform_0(%arg0: i32) -> (i32, i32) {
    %c0_i32 = arith.constant 0 : i32
    %c0_i32_0 = arith.constant 0 : i32
    %c0_i32_1 = arith.constant 0 : i32
    return %c0_i32, %c0_i32_0 : i32, i32
  }
  func.func @transform_1(%arg0: i32) -> (i32, i32) {
    %c0_i32 = arith.constant 0 : i32
    %c0_i32_0 = arith.constant 0 : i32
    %c0_i32_1 = arith.constant 0 : i32
    return %c0_i32, %c0_i32_0 : i32, i32
  }
  func.func @transform_2(%arg0: i32) -> (i32, i32) {
    %c0_i32 = arith.constant 0 : i32
    %c0_i32_0 = arith.constant 0 : i32
    %c0_i32_1 = arith.constant 0 : i32
    return %c0_i32, %c0_i32_0 : i32, i32
  }
  func.func @transform_3(%arg0: i32) -> (i32, i32) {
    %c0_i32 = arith.constant 0 : i32
    %c0_i32_0 = arith.constant 0 : i32
    %c0_i32_1 = arith.constant 0 : i32
    return %c0_i32, %c0_i32_0 : i32, i32
  }
  func.func @transform_4(%arg0: i32) -> (i32, i32) {
    %c0_i32 = arith.constant 0 : i32
    %c0_i32_0 = arith.constant 0 : i32
    %c0_i32_1 = arith.constant 0 : i32
    return %c0_i32, %c0_i32_0 : i32, i32
  }
  func.func @transform_5(%arg0: i32) -> (i32, i32) {
    %c0_i32 = arith.constant 0 : i32
    %c0_i32_0 = arith.constant 0 : i32
    %c0_i32_1 = arith.constant 0 : i32
    return %c0_i32, %c0_i32_0 : i32, i32
  }
  func.func @transform_6(%arg0: i32) -> (i32, i32) {
    %c0_i32 = arith.constant 0 : i32
    %c0_i32_0 = arith.constant 0 : i32
    %c0_i32_1 = arith.constant 0 : i32
    return %c0_i32, %c0_i32_0 : i32, i32
  }
  func.func @transform_7(%arg0: i32) -> (i32, i32) {
    %c0_i32 = arith.constant 0 : i32
    %c0_i32_0 = arith.constant 0 : i32
    %c0_i32_1 = arith.constant 0 : i32
    return %c0_i32, %c0_i32_0 : i32, i32
  }
  func.func @transform_8(%arg0: i32) -> (i32, i32) {
    %c0_i32 = arith.constant 0 : i32
    %c0_i32_0 = arith.constant 0 : i32
    %c0_i32_1 = arith.constant 0 : i32
    return %c0_i32, %c0_i32_0 : i32, i32
  }
  func.func @transform_9(%arg0: i32) -> (i32, i32) {
    %c0_i32 = arith.constant 0 : i32
    %c0_i32_0 = arith.constant 0 : i32
    %c0_i32_1 = arith.constant 0 : i32
    return %c0_i32, %c0_i32_0 : i32, i32
  }
  func.func @transform_10(%arg0: i32) -> (i32, i32) {
    %c0_i32 = arith.constant 0 : i32
    %c0_i32_0 = arith.constant 0 : i32
    %c0_i32_1 = arith.constant 0 : i32
    return %c0_i32, %c0_i32_0 : i32, i32
  }
}

</mosaic_0001>

<bundles_post_ra>
// kernel: inverted_residual.1
= control target key start
LH: loop header
LB: loop body
LE: loop exit
PB: predicated region body
PF: predicated region fallthrough
CT: control target
= control target key end

     0   :  { %v105_v0 = vlaneseq  ;;  %v4797_v4 = vmov 0.0   ;;  %s2736_s17 = smov 32   ;;  %s2737_s23 = smov 96   ;;  %s4786_s1 = inlined_call_operand.vmem [shape: f32[128,512], index: 1, kind: input, shape index: {}]   ;;  %s4787_s0 = inlined_call_operand.vmem [shape: f32[32,128], index: 0, kind: input, shape index: {}]   ;;  %s4788_s3 = inlined_call_operand.vmem [shape: f32[11,512], index: 3, kind: input, shape index: {}]   ;;  %s4789_s6 = inlined_call_operand.vmem [shape: f32[32,32], index: 6, kind: input, shape index: {}]   ;;  %s4790_s5 = inlined_call_operand.vmem [shape: f32[32,32], index: 5, kind: input, shape index: {}]   ;;  %s4791_s7 = inlined_call_operand.vmem [shape: f32[8,32], index: 7, kind: input, shape index: {}]   ;;  %s4792_s9 = inlined_call_operand.vmem [shape: f32[66,32], index: 9, kind: input, shape index: {}]   ;;  %s4793_s2 = inlined_call_operand.vmem [shape: f32[512,128], index: 2, kind: input, shape index: {}]   ;;  %s4794_s8 = inlined_call_operand.vmem [shape: f32[32,8], index: 8, kind: input, shape index: {}]   ;;  %s4795_s4 = inlined_call_operand.vmem [shape: f32[1,128], index: 4, kind: input, shape index: {}]   ;;  %s4796_s10 = inlined_call_operand.vmem [shape: f32[32,128], index: 10, kind: output, shape index: {}]  }
   0x1   :  { %v40_v1 = vld [vmem:[%s4786_s1 + $0x8] sm:$0xff]  ;;  %v42_v3 = vld [vmem:[%s4786_s1 + $0x18] sm:$0xff]  ;;  %189 = vmatprep.mubr.f32.mxu0 %v4797_v4  ;;  %278 = vmatprep.mubr.f32.mxu1 %v4797_v4  ;;  %v39_v7 = vld [vmem:[%s4786_s1] sm:$0xff]  ;;  %s2739_s25 = smov 64  }
   0x2   :  { %v44_v2 = vld [vmem:[%s4786_s1 + $0x28] sm:$0xff]  ;;  %v46_v6 = vld [vmem:[%s4786_s1 + $0x38] sm:$0xff]  ;;  %v43_v8 = vld [vmem:[%s4786_s1 + $0x20] sm:$0xff]  ;;  %v2817_v9 = vand.u32 127, %v105_v0 }
   0x3   :  { %v2503_v5 = vpack.c.bf16 %v44_v2, %v40_v1  ;;  %v2535_v10 = vpack.c.bf16 %v46_v6, %v42_v3  ;;  %v2505_v11 = vpack.c.bf16 %v43_v8, %v39_v7  ;;  %v41_v12 = vld [vmem:[%s4786_s1 + $0x10] sm:$0xff]  ;;  %v48_v14 = vld [vmem:[%s4786_s1 + $0x48] sm:$0xff]  ;;  %v50_v17 = vld [vmem:[%s4786_s1 + $0x58] sm:$0xff] }
   0x4   :  { %4882 = vst [vmem:[#allocation2_spill] sm:$0xff] %v2817_v9  ;;  %v45_v13 = vld [vmem:[%s4786_s1 + $0x30] sm:$0xff]  ;;  %v52_v16 = vld [vmem:[%s4786_s1 + $0x68] sm:$0xff]  ;;  %v54_v18 = vld [vmem:[%s4786_s1 + $0x78] sm:$0xff]  ;;  %437 = vrot.lane.b32.xlu0 %v2817_v9, %s2736_s17  ;;  %v2858_v28 = vadd.s32 128, %v2817_v9  ;;  %v2881_v38 = vadd.s32 256, %v2817_v9 }
   0x5   :  { %2504 = vmatprep.subr.bf16.mxu0 %v2503_v5  ;;  %v2537_v15 = vpack.c.bf16 %v45_v13, %v41_v12  ;;  %2536 = vmatprep.subr.bf16.mxu1 %v2535_v10  ;;  %v2507_v19 = vpack.c.bf16 %v52_v16, %v48_v14  ;;  %v2539_v20 = vpack.c.bf16 %v54_v18, %v50_v17  ;;  %v47_v21 = vld [vmem:[%s4786_s1 + $0x40] sm:$0xff]  ;;  %v49_v23 = vld [vmem:[%s4786_s1 + $0x50] sm:$0xff]  ;;  %v56_v26 = vld [vmem:[%s4786_s1 + $0x88] sm:$0xff]  ;;  %v2895_v43 = vadd.s32 384, %v2817_v9 }
   0x6   :  { %2506 = vmatpush1.bf16.msra.mxu0 %v2505_v11  ;;  %v51_v22 = vld [vmem:[%s4786_s1 + $0x60] sm:$0xff]  ;;  %v53_v25 = vld [vmem:[%s4786_s1 + $0x70] sm:$0xff]  ;;  %v60_v27 = vld [vmem:[%s4786_s1 + $0xa8] sm:$0xff]  ;;  %500 = vrot.lane.b32.xlu1 %v2858_v28, %s2737_s23  ;;  %vm420_vm0 = vcmp.lt.s32.totalorder %v2817_v9, 32  ;;  %vm481_vm1 = vcmp.lt.s32.totalorder %v2817_v9, 96 }
   0x7   :  { %2538 = vmatpush1.bf16.msra.mxu1 %v2537_v15  ;;  %v2509_v24 = vpack.c.bf16 %v51_v22, %v47_v21  ;;  %2508 = vmatprep.subr.bf16.mxu0 %v2507_v19  ;;  %v2541_v29 = vpack.c.bf16 %v53_v25, %v49_v23  ;;  %v2511_v30 = vpack.c.bf16 %v60_v27, %v56_v26  ;;  %v58_v31 = vld [vmem:[%s4786_s1 + $0x98] sm:$0xff]  ;;  %v55_v33 = vld [vmem:[%s4786_s1 + $0x80] sm:$0xff]  ;;  %v57_v36 = vld [vmem:[%s4786_s1 + $0x90] sm:$0xff] }
   0x8   :  { %2540 = vmatprep.subr.bf16.mxu1 %v2539_v20  ;;  %v62_v32 = vld [vmem:[%s4786_s1 + $0xb8] sm:$0xff]  ;;  %v59_v35 = vld [vmem:[%s4786_s1 + $0xa0] sm:$0xff]  ;;  %v61_v37 = vld [vmem:[%s4786_s1 + $0xb0] sm:$0xff]  ;;  %439 = vrot.lane.b32.xlu0 %v2858_v28, %s2736_s17 }
   0x9   :  { %v2543_v34 = vpack.c.bf16 %v62_v32, %v58_v31  ;;  %v2513_v39 = vpack.c.bf16 %v59_v35, %v55_v33  ;;  %v64_v40 = vld [vmem:[%s4786_s1 + $0xc8] sm:$0xff]  ;;  %v66_v42 = vld [vmem:[%s4786_s1 + $0xd8] sm:$0xff]  ;;  %v2545_v44 = vpack.c.bf16 %v61_v37, %v57_v36  ;;  %v63_v47 = vld [vmem:[%s4786_s1 + $0xc0] sm:$0xff] }
   0xa   :  { %2510 = vmatpush1.bf16.msra.mxu0 %v2509_v24  ;;  %v68_v41 = vld [vmem:[%s4786_s1 + $0xe8] sm:$0xff]  ;;  %v70_v46 = vld [vmem:[%s4786_s1 + $0xf8] sm:$0xff]  ;;  %v67_v48 = vld [vmem:[%s4786_s1 + $0xe0] sm:$0xff]  ;;  %502 = vrot.lane.b32.xlu1 %v2881_v38, %s2737_s23 }
   0xb   :  { %2542 = vmatpush1.bf16.msra.mxu1 %v2541_v29  ;;  %2512 = vmatprep.subr.bf16.mxu0 %v2511_v30  ;;  %v2515_v45 = vpack.c.bf16 %v68_v41, %v64_v40  ;;  %v2547_v49 = vpack.c.bf16 %v70_v46, %v66_v42  ;;  %v65_v50 = vld [vmem:[%s4786_s1 + $0xd0] sm:$0xff]  ;;  %v72_v52 = vld [vmem:[%s4786_s1 + $0x108] sm:$0xff]  ;;  %v74_v54 = vld [vmem:[%s4786_s1 + $0x118] sm:$0xff]  ;;  %v2517_v56 = vpack.c.bf16 %v67_v48, %v63_v47  ;;  %v106_v48 = vshrl.u32 %v105_v0, 7 }
   0xc   :  { %2544 = vmatprep.subr.bf16.mxu1 %v2543_v34  ;;  %v69_v51 = vld [vmem:[%s4786_s1 + $0xf0] sm:$0xff]  ;;  %v76_v53 = vld [vmem:[%s4786_s1 + $0x128] sm:$0xff]  ;;  %v78_v55 = vld [vmem:[%s4786_s1 + $0x138] sm:$0xff]  ;;  %443 = vrot.lane.b32.xlu0 %v2895_v43, %s2736_s17 }
   0xd   :  { %v2549_v57 = vpack.c.bf16 %v69_v51, %v65_v50  ;;  %v2519_v58 = vpack.c.bf16 %v76_v53, %v72_v52  ;;  %v71_v59 = vld [vmem:[%s4786_s1 + $0x100] sm:$0xff]  ;;  %v73_v61 = vld [vmem:[%s4786_s1 + $0x110] sm:$0xff]  ;;  %v2551_v62 = vpack.c.bf16 %v78_v55, %v74_v54  ;;  %v80_v1 = vld [vmem:[%s4786_s1 + $0x148] sm:$0xff]  ;;  %v3041_v50 = vsub.s32 1, %v106_v48 }
   0xe   :  { %2514 = vmatpush1.bf16.msra.mxu0 %v2513_v39  ;;  %v75_v60 = vld [vmem:[%s4786_s1 + $0x120] sm:$0xff]  ;;  %v77_v63 = vld [vmem:[%s4786_s1 + $0x130] sm:$0xff]  ;;  %v84_v2 = vld [vmem:[%s4786_s1 + $0x168] sm:$0xff]  ;;  %498 = vrot.lane.b32.xlu1 %v2817_v9, %s2737_s23  ;;  %v3043_v51 = vsub.s32 2, %v106_v48  ;;  %v3057_v0 = vsub.s32 3, %v106_v48 }
   0xf   :  { %2546 = vmatpush1.bf16.msra.mxu1 %v2545_v44  ;;  %2516 = vmatprep.subr.bf16.mxu0 %v2515_v45  ;;  %v82_v3 = vld [vmem:[%s4786_s1 + $0x158] sm:$0xff]  ;;  %v2521_v6 = vpack.c.bf16 %v75_v60, %v71_v59  ;;  %v2553_v7 = vpack.c.bf16 %v77_v63, %v73_v61  ;;  %v2523_v8 = vpack.c.bf16 %v84_v2, %v80_v1  ;;  %v79_v10 = vld [vmem:[%s4786_s1 + $0x140] sm:$0xff]  ;;  %v81_v12 = vld [vmem:[%s4786_s1 + $0x150] sm:$0xff] }
  0x10   :  { %2548 = vmatprep.subr.bf16.mxu1 %v2547_v49  ;;  %v86_v5 = vld [vmem:[%s4786_s1 + $0x178] sm:$0xff]  ;;  %441 = vrot.lane.b32.xlu0 %v2881_v38, %s2736_s17  ;;  %v83_v11 = vld [vmem:[%s4786_s1 + $0x160] sm:$0xff]  ;;  %v85_v14 = vld [vmem:[%s4786_s1 + $0x170] sm:$0xff]  ;;  %v3039_v49 = vsub.s32 0, %v106_v48  ;;  %4884 = vst [vmem:[#allocation4_spill] sm:$0xff] %v3041_v50 }
  0x11   :  { %v2555_v13 = vpack.c.bf16 %v86_v5, %v82_v3  ;;  %v88_v15 = vld [vmem:[%s4786_s1 + $0x188] sm:$0xff]  ;;  %v90_v17 = vld [vmem:[%s4786_s1 + $0x198] sm:$0xff]  ;;  %v2525_v19 = vpack.c.bf16 %v83_v11, %v79_v10  ;;  %v2557_v20 = vpack.c.bf16 %v85_v14, %v81_v12  ;;  %v87_v22 = vld [vmem:[%s4786_s1 + $0x180] sm:$0xff]  ;;  %4885 = vst [vmem:[#allocation5_spill] sm:$0xff] %v3043_v51 }
  0x12   :  { %2518 = vmatpush1.bf16.msra.mxu0 %v2517_v56  ;;  %v92_v16 = vld [vmem:[%s4786_s1 + $0x1a8] sm:$0xff]  ;;  %v94_v18 = vld [vmem:[%s4786_s1 + $0x1b8] sm:$0xff]  ;;  %504 = vrot.lane.b32.xlu1 %v2895_v43, %s2737_s23  ;;  %v91_v23 = vld [vmem:[%s4786_s1 + $0x1a0] sm:$0xff]  ;;  %4883 = vst [vmem:[#allocation3_spill] sm:$0xff] %v3039_v49 }
  0x13   :  { %2550 = vmatpush1.bf16.msra.mxu1 %v2549_v57  ;;  %2520 = vmatprep.subr.bf16.mxu0 %v2519_v58  ;;  %v2527_v21 = vpack.c.bf16 %v92_v16, %v88_v15  ;;  %v89_v24 = vld [vmem:[%s4786_s1 + $0x190] sm:$0xff]  ;;  %v2559_v25 = vpack.c.bf16 %v94_v18, %v90_v17  ;;  %v96_v27 = vld [vmem:[%s4786_s1 + $0x1c8] sm:$0xff]  ;;  %v98_v30 = vld [vmem:[%s4786_s1 + $0x1d8] sm:$0xff]  ;;  %v2529_v32 = vpack.c.bf16 %v91_v23, %v87_v22 }
  0x14   :  { %2552 = vmatprep.subr.bf16.mxu1 %v2551_v62  ;;  %v93_v26 = vld [vmem:[%s4786_s1 + $0x1b0] sm:$0xff]  ;;  %v100_v29 = vld [vmem:[%s4786_s1 + $0x1e8] sm:$0xff]  ;;  %v102_v31 = vld [vmem:[%s4786_s1 + $0x1f8] sm:$0xff]  ;;  %4886 = vst [vmem:[#allocation6_spill] sm:$0xff] %v3057_v0 }
  0x15   :  { %v2561_v33 = vpack.c.bf16 %v93_v26, %v89_v24  ;;  %v2531_v34 = vpack.c.bf16 %v100_v29, %v96_v27  ;;  %v95_v35 = vld [vmem:[%s4786_s1 + $0x1c0] sm:$0xff]  ;;  %v2563_v37 = vpack.c.bf16 %v102_v31, %v98_v30  ;;  %v97_v39 = vld [vmem:[%s4786_s1 + $0x1d0] sm:$0xff]  ;;  %v36_v45 = vld [vmem:[%s4787_s0 + $0x8] sm:$0xff] }
  0x16   :  { %2522 = vmatpush1.bf16.msra.mxu0 %v2521_v6  ;;  %v99_v36 = vld [vmem:[%s4786_s1 + $0x1e0] sm:$0xff]  ;;  %v101_v40 = vld [vmem:[%s4786_s1 + $0x1f0] sm:$0xff]  ;;  %v38_v47 = vld [vmem:[%s4787_s0 + $0x18] sm:$0xff] }
  0x17   :  { %2554 = vmatpush1.bf16.msra.mxu1 %v2553_v7  ;;  %2524 = vmatprep.subr.bf16.mxu0 %v2523_v8  ;;  %v2533_v41 = vpack.c.bf16 %v99_v36, %v95_v35  ;;  %v2565_v42 = vpack.c.bf16 %v101_v40, %v97_v39  ;;  %v35_v44 = vld [vmem:[%s4787_s0] sm:$0xff]  ;;  %v37_v46 = vld [vmem:[%s4787_s0 + $0x10] sm:$0xff] }
  0x18   :  { %2556 = vmatprep.subr.bf16.mxu1 %v2555_v13  ;;  %v103_v52 = vld [vmem:[%s4788_s3] ss:$8 sm:$0xf] }
  0x19   :  { %v3049_v53 = vrot.slane %v103_v52, %v3039_v49  ;;  %v3052_v54 = vrot.slane %v103_v52, %v3043_v51  ;;  %v3055_v55 = vrot.slane %v103_v52, %v3041_v50  ;;  %v3063_v1 = vrot.slane %v103_v52, %v3057_v0 }
  0x1a   :  { %2526 = vmatpush1.bf16.msra.mxu0 %v2525_v19 }
  0x1b   :  { %2558 = vmatpush1.bf16.msra.mxu1 %v2557_v20  ;;  %2528 = vmatprep.subr.bf16.mxu0 %v2527_v21 }
  0x1c   :  { %2560 = vmatprep.subr.bf16.mxu1 %v2559_v25 }
  0x1e   :  { %2530 = vmatpush1.bf16.msra.mxu0 %v2529_v32 }
  0x1f   :  { %2562 = vmatpush1.bf16.msra.mxu1 %v2561_v33  ;;  %2532 = vmatprep.subr.bf16.mxu0 %v2531_v34 }
  0x20   :  { %2564 = vmatprep.subr.bf16.mxu1 %v2563_v37 }
  0x22   :  { %2534 = vmatpush1.bf16.msra.mxu0 %v2533_v41 }
  0x23   :  { %2566 = vmatpush1.bf16.msra.mxu1 %v2565_v42 }
  0x25   :  { %190 = vmatmul.mubr.f32.vlgmr.msra.gmra.mrb[0].mxu0 %v35_v44 }
  0x26   :  { %279 = vmatmul.mubr.f32.vlgmr.msra.gmra.mrb[0].mxu1 %v35_v44  ;;  %195 = vmatprep.mubr.f32.mxu0 %v4797_v4 }
  0x27   :  { %284 = vmatprep.mubr.f32.mxu1 %v4797_v4 }
  0x29   :  { %196 = vmatmul.mubr.f32.gmra.mrb[2].mxu0 %v36_v45 }
  0x2a   :  { %285 = vmatmul.mubr.f32.gmra.mrb[2].mxu1 %v36_v45  ;;  %201 = vmatprep.mubr.f32.mxu0 %v4797_v4 }
  0x2b   :  { %290 = vmatprep.mubr.f32.mxu1 %v4797_v4 }
  0x2d   :  { %202 = vmatmul.mubr.f32.gmra.mrb[4].mxu0 %v37_v46 }
  0x2e   :  { %207 = vmatprep.mubr.f32.mxu0 %v4797_v4  ;;  %291 = vmatmul.mubr.f32.gmra.mrb[4].mxu1 %v37_v46 }
  0x2f   :  { %296 = vmatprep.mubr.f32.mxu1 %v4797_v4 }
  0x31   :  { %208 = vmatmul.mubr.f32.gmra.mrb[6].mxu0 %v38_v47 }
  0x32   :  { %297 = vmatmul.mubr.f32.gmra.mrb[6].mxu1 %v38_v47  ;;  %1009 = vmatprep.mubr.f32.mxu0 %v4797_v4 }
  0x33   :  { %1098 = vmatprep.mubr.f32.mxu1 %v4797_v4 }
  0xf8   :  { %v191_v56 = vpop.f32.mrb[0].mxu0 }
  0xf9   :  { %v192_v57 = vadd.f32 %v191_v56, %v3049_v53  ;;  %v280_v58 = vpop.f32.mrb[0].mxu1  ;;  %v193_v59 = vpop.f32.mrb[1].mxu0 }
  0xfa   :  { %v281_v60 = vadd.f32 %v280_v58, %v3052_v54  ;;  %v194_v61 = vadd.f32 %v193_v59, %v3055_v55  ;;  %v282_v62 = vpop.f32.mrb[1].mxu1 }
  0xfb   :  { %v303_v63 = vadd.f32 3.0, %v192_v57  ;;  %v283_v15 = vadd.f32 %v282_v62, %v3063_v1 }
  0xfc   :  { %v305_v2 = vadd.f32 3.0, %v281_v60  ;;  %v304_v3 = vadd.f32 3.0, %v194_v61  ;;  %v197_v5 = vpop.f32.mrb[2].mxu0 }
  0xfd   :  { %v319_v6 = vmax.f32 %v303_v63, 0.0  ;;  %v198_v7 = vadd.f32 %v197_v5, %v3049_v53  ;;  %v199_v8 = vpop.f32.mrb[3].mxu0  ;;  %v286_v10 = vpop.f32.mrb[2].mxu1  ;;  %v306_v26 = vadd.f32 3.0, %v283_v15 }
  0xfe   :  { %v321_v11 = vmax.f32 %v305_v2, 0.0  ;;  %v320_v12 = vmax.f32 %v304_v3, 0.0  ;;  %v288_v13 = vpop.f32.mrb[3].mxu1  ;;  %v287_v19 = vadd.f32 %v286_v10, %v3052_v54  ;;  %v200_v27 = vadd.f32 %v199_v8, %v3055_v55 }
  0xff   :  { %v335_v14 = vmin.f32 %v319_v6, 6.0  ;;  %v307_v16 = vadd.f32 3.0, %v198_v7  ;;  %v322_v40 = vmax.f32 %v306_v26, 0.0  ;;  %v289_v41 = vadd.f32 %v288_v13, %v3063_v1 }
 0x100   :  { %v337_v17 = vmin.f32 %v321_v11, 6.0  ;;  %v336_v18 = vmin.f32 %v320_v12, 6.0  ;;  %v203_v20 = vpop.f32.mrb[4].mxu0  ;;  %v309_v33 = vadd.f32 3.0, %v287_v19  ;;  %v308_v45 = vadd.f32 3.0, %v200_v27 }
 0x101   :  { %v351_v21 = vmul.f32 0.16666667, %v335_v14  ;;  %v323_v22 = vmax.f32 %v307_v16, 0.0  ;;  %v205_v23 = vpop.f32.mrb[5].mxu0  ;;  %v292_v29 = vpop.f32.mrb[4].mxu1  ;;  %v338_v47 = vmin.f32 %v322_v40, 6.0 }
 0x102   :  { %v353_v24 = vmul.f32 0.16666667, %v337_v17  ;;  %v352_v31 = vmul.f32 0.16666667, %v336_v18  ;;  %v3073_v35 = vpop.f32.mrb[5].mxu1  ;;  %v325_v46 = vmax.f32 %v309_v33, 0.0  ;;  %v293_v6 = vadd.f32 %v292_v29, %v3052_v54 }
 0x103   :  { %v3068_v25 = vmul.f32 %v351_v21, %v192_v57  ;;  %v339_v32 = vmin.f32 %v323_v22, 6.0  ;;  %v310_v48 = vadd.f32 3.0, %v289_v41  ;;  %v324_v56 = vmax.f32 %v308_v45, 0.0 }
 0x104   :  { %v3071_v30 = vmul.f32 %v353_v24, %v281_v60  ;;  %v209_v34 = vpop.f32.mrb[6].mxu0  ;;  %v3082_v42 = vmul.f32 %v352_v31, %v194_v61  ;;  %v341_v57 = vmin.f32 %v325_v46, 6.0  ;;  %v354_v58 = vmul.f32 0.16666667, %v338_v47 }
 0x105   :  { %388 = vrot.lane.b32.xlu0 %v3068_v25, %s2736_s17  ;;  %v211_v36 = vpop.f32.mrb[7].mxu0  ;;  %v298_v37 = vpop.f32.mrb[6].mxu1  ;;  %v355_v44 = vmul.f32 0.16666667, %v339_v32  ;;  %v326_v59 = vmax.f32 %v310_v48, 0.0  ;;  %v204_v60 = vadd.f32 %v203_v20, %v3049_v53  ;;  %v340_v61 = vmin.f32 %v324_v56, 6.0 }
 0x106   :  { %465 = vrot.lane.b32.xlu1 %v3071_v30, %s2737_s23  ;;  %v3079_v39 = vpop.f32.mrb[7].mxu1  ;;  %v357_v62 = vmul.f32 0.16666667, %v341_v57  ;;  %v210_v63 = vadd.f32 %v209_v34, %v3049_v53  ;;  %v3100_v2 = vmul.f32 %v354_v58, %v283_v15  ;;  %v299_v11 = vadd.f32 %v298_v37, %v3052_v54 }
 0x107   :  { %v3088_v52 = vmul.f32 %v355_v44, %v198_v7  ;;  %v342_v3 = vmin.f32 %v326_v59, 6.0  ;;  %v311_v5 = vadd.f32 3.0, %v204_v60  ;;  %v356_v7 = vmul.f32 0.16666667, %v340_v61 }
 0x108   :  { %v3103_v8 = vmul.f32 %v357_v62, %v287_v19  ;;  %v315_v10 = vadd.f32 3.0, %v210_v63  ;;  %v313_v12 = vadd.f32 3.0, %v293_v6  ;;  %v317_v16 = vadd.f32 3.0, %v299_v11 }
 0x109   :  { %449 = vrot.lane.b32.xlu0 %v3068_v25, %s2737_s23  ;;  %v327_v53 = vmax.f32 %v311_v5, 0.0  ;;  %v3110_v13 = vmul.f32 %v356_v7, %v200_v27  ;;  %v358_v14 = vmul.f32 0.16666667, %v342_v3  ;;  %v206_v17 = vadd.f32 %v205_v23, %v3055_v55  ;;  %v501_v7 = vpop.permute.xlu1 %500 }
 0x10a   :  { %457 = vrot.lane.b32.xlu1 %v3082_v42, %s2737_s23  ;;  %v331_v15 = vmax.f32 %v315_v10, 0.0  ;;  %v329_v18 = vmax.f32 %v313_v12, 0.0  ;;  %v212_v21 = vadd.f32 %v211_v36, %v3055_v55  ;;  %v333_v22 = vmax.f32 %v317_v16, 0.0 }
 0x10b   :  { %v343_v54 = vmin.f32 %v327_v53, 6.0  ;;  %v3117_v19 = vmul.f32 %v358_v14, %v289_v41  ;;  %v312_v26 = vadd.f32 3.0, %v206_v17  ;;  %v295_v34 = vadd.f32 %v3073_v35, %v3063_v1  ;;  %v2350_v14 = vld [vmem:[%s4788_s3 + $0x3] ss:$8 sm:$0xf] }
 0x10c   :  { %v347_v20 = vmin.f32 %v331_v15, 6.0  ;;  %v345_v27 = vmin.f32 %v329_v18, 6.0  ;;  %v316_v31 = vadd.f32 3.0, %v212_v21  ;;  %v349_v32 = vmin.f32 %v333_v22, 6.0 }
 0x10d   :  { %404 = vrot.lane.b32.xlu0 %v3071_v30, %s2736_s17  ;;  %v359_v24 = vmul.f32 0.16666667, %v343_v54  ;;  %v328_v23 = vmax.f32 %v312_v26, 0.0  ;;  %v301_v41 = vadd.f32 %v3079_v39, %v3063_v1  ;;  %v314_v46 = vadd.f32 3.0, %v295_v34  ;;  %v503_v10 = vpop.permute.xlu1 %502 }
 0x10e   :  { %390 = vrot.lane.b32.xlu1 %v3088_v52, %s2736_s17  ;;  %v363_v29 = vmul.f32 0.16666667, %v347_v20  ;;  %v361_v33 = vmul.f32 0.16666667, %v345_v27  ;;  %v332_v37 = vmax.f32 %v316_v31, 0.0  ;;  %v3189_v16 = vrot.slane %v2350_v14, %v3039_v49 }
 0x10f   :  { %v3128_v55 = vmul.f32 %v359_v24, %v204_v60  ;;  %v365_v40 = vmul.f32 0.16666667, %v349_v32  ;;  %v344_v44 = vmin.f32 %v328_v23, 6.0  ;;  %v318_v35 = vadd.f32 3.0, %v301_v41 }
 0x110   :  { %v3132_v36 = vmul.f32 %v363_v29, %v210_v63  ;;  %v3140_v45 = vmul.f32 %v361_v33, %v293_v6  ;;  %v348_v47 = vmin.f32 %v332_v37, 6.0  ;;  %v330_v39 = vmax.f32 %v314_v46, 0.0  ;;  %v438_v6 = vpop.permute.xlu0 %437  ;;  %v2361_v15 = vld [vmem:[%s4788_s3 + $0x21] ss:$8 sm:$0xf] }
 0x111   :  { %396 = vrot.lane.b32.xlu0 %v3082_v42, %s2736_s17  ;;  %v3142_v48 = vmul.f32 %v365_v40, %v299_v11  ;;  %v360_v1 = vmul.f32 0.16666667, %v344_v44  ;;  %v334_v57 = vmax.f32 %v318_v35, 0.0  ;;  %v499_v53 = vpop.permute.xlu1 %498  ;;  %v3192_v54 = vrot.slane %v2361_v15, %v3039_v49  ;;  %v2347_v26 = vld [vmem:[%s4788_s3 + $0x6] ss:$8 sm:$0xf] }
 0x112   :  { %451 = vrot.lane.b32.xlu1 %v3088_v52, %s2737_s23  ;;  %v364_v56 = vmul.f32 0.16666667, %v348_v47  ;;  %v346_v59 = vmin.f32 %v330_v39, 6.0  ;;  %v3198_v18 = vrot.slane %v2361_v15, %v3043_v51  ;;  %v3201_v20 = vrot.slane %v2350_v14, %v3041_v50  ;;  %v2360_v44 = vld [vmem:[%s4788_s3 + $0x20] ss:$8 sm:$0xf] }
 0x113   :  { %v3152_v58 = vmul.f32 %v360_v1, %v206_v17  ;;  %v350_v61 = vmin.f32 %v334_v57, 6.0  ;;  %v3195_v17 = vrot.slane %v2350_v14, %v3043_v51  ;;  %v3207_v22 = vrot.slane %v2361_v15, %v3041_v50 }
 0x114   :  { %v3154_v60 = vmul.f32 %v364_v56, %v212_v21  ;;  %v362_v62 = vmul.f32 0.16666667, %v346_v59  ;;  %v440_v11 = vpop.permute.xlu0 %439  ;;  %v3204_v21 = vrot.slane %v2350_v14, %v3057_v0  ;;  %v3210_v24 = vrot.slane %v2361_v15, %v3057_v0 }
 0x115   :  { %412 = vrot.lane.b32.xlu0 %v3100_v2, %s2736_s17  ;;  %v366_v63 = vmul.f32 0.16666667, %v350_v61  ;;  %v3216_v27 = vadd.s32 4294967264, %v2858_v28  ;;  %v3219_v29 = vadd.s32 32, %v2858_v28  ;;  %v3222_v31 = vadd.s32 4294967264, %v2817_v9  ;;  %v505_v28 = vpop.permute.xlu1 %504 }
 0x116   :  { %406 = vrot.lane.b32.xlu1 %v3103_v8, %s2736_s17  ;;  %v3164_v3 = vmul.f32 %v362_v62, %v295_v34  ;;  %v3225_v32 = vadd.s32 32, %v2817_v9  ;;  %v3228_v23 = vadd.s32 4294967264, %v2881_v38  ;;  %v3231_v33 = vadd.s32 4294967264, %v2895_v43 }
 0x117   :  { %v3166_v5 = vmul.f32 %v366_v63, %v301_v41  ;;  %v3234_v34 = vadd.s32 32, %v2881_v38  ;;  %v3237_v37 = vadd.s32 32, %v2895_v43  ;;  %v2349_v41 = vld [vmem:[%s4788_s3 + $0x2] ss:$8 sm:$0xf]  ;;  %v3246_v46 = vrot.slane %v2347_v26, %v3039_v49 }
 0x118   :  { %v444_v12 = vpop.permute.xlu0 %443  ;;  %4888 = vst [vmem:[#allocation8_spill] sm:$0xff] %v3228_v23  ;;  %4889 = vst [vmem:[#allocation9_spill] sm:$0xff] %v3231_v33  ;;  %v3249_v47 = vrot.slane %v2347_v26, %v3041_v50  ;;  %v3252_v38 = vrot.slane %v2347_v26, %v3043_v51  ;;  %v3255_v43 = vrot.slane %v2347_v26, %v3057_v0  ;;  %v3292_v63 = vld [vmem:[%s4788_s3 + $0x4] ss:$8 sm:$0xf] }
 0x119   :  { %473 = vrot.lane.b32.xlu0 %v3100_v2, %s2737_s23  ;;  %4887 = vst [vmem:[#allocation7_spill] sm:$0xff] %v3166_v5  ;;  %4890 = vst [vmem:[#allocation10_spill] sm:$0xff] %v3234_v34  ;;  %v3259_v35 = vsel %vm481_vm1, %v501_v7, %v503_v10  ;;  %v3263_v1 = vsel %vm420_vm0, %v438_v6, %v440_v11  ;;  %v3267_v39 = vsel %vm481_vm1, %v499_v53, %v501_v7 }
 0x11a   :  { %398 = vrot.lane.b32.xlu1 %v3110_v13, %s2736_s17  ;;  %4891 = vst [vmem:[#allocation11_spill] sm:$0xff] %v3237_v37  ;;  %4892 = vst [vmem:[#allocation12_spill] sm:$0xff] %v3255_v43  ;;  %v3271_v56 = vsel %vm420_vm0, %v444_v12, %v438_v6  ;;  %v3275_v57 = vsel %vm481_vm1, %v503_v10, %v505_v28  ;;  %v3279_v59 = vsel %vm481_vm1, %v505_v28, %v499_v53 }
 0x11b   :  { %4893 = vst [vmem:[#allocation13_spill] sm:$0xff] %v3263_v1  ;;  %4894 = vst [vmem:[#allocation14_spill] sm:$0xff] %v3275_v57  ;;  %v3295_v6 = vrot.slane %v2349_v41, %v3041_v50  ;;  %v3298_v7 = vrot.slane %v2360_v44, %v3041_v50  ;;  %v3301_v10 = vrot.slane %v2349_v41, %v3039_v49 }
 0x11c   :  { %v442_v40 = vpop.permute.xlu0 %441  ;;  %4895 = vst [vmem:[#allocation15_spill] sm:$0xff] %v3279_v59  ;;  %v3305_v53 = vrot.slane %v3292_v63, %v3039_v49  ;;  %v3321_v15 = vmul.f32 %v3189_v16, %v3068_v25  ;;  %v3325_v26 = vmul.f32 %v3192_v54, %v3068_v25  ;;  %v3328_v28 = vrot.slane %v2349_v41, %v3043_v51 }
 0x11d   :  { %467 = vrot.lane.b32.xlu0 %v3103_v8, %s2737_s23  ;;  %v3283_v61 = vsel %vm420_vm0, %v442_v40, %v444_v12  ;;  %v3287_v62 = vsel %vm420_vm0, %v440_v11, %v442_v40  ;;  %v3310_v11 = vld [vmem:[%s4788_s3 + $0x22] ss:$8 sm:$0xf]  ;;  %v3313_v12 = vrot.slane %v2360_v44, %v3039_v49  ;;  %v3331_v40 = vrot.slane %v2349_v41, %v3057_v0 }
 0x11e   :  { %414 = vrot.lane.b32.xlu1 %v3117_v19, %s2736_s17  ;;  %4896 = vst [vmem:[#allocation16_spill] sm:$0xff] %v3283_v61  ;;  %4897 = vst [vmem:[#allocation17_spill] sm:$0xff] %v3287_v62  ;;  %v3317_v14 = vrot.slane %v3310_v11, %v3039_v49  ;;  %v3335_v4 = vmul.f32 %v3195_v17, %v3071_v30  ;;  %v3353_v41 = vrot.slane %v3310_v11, %v3043_v51 }
 0x11f   :  { %4898 = vst [vmem:[#allocation18_spill] sm:$0xff] %v3305_v53  ;;  %4899 = vst [vmem:[#allocation19_spill] sm:$0xff] %v3313_v12  ;;  %v3345_v12 = vrot.slane %v2360_v44, %v3057_v0  ;;  %v3409_v53 = vmul.f32 %v3192_v54, %v3128_v55  ;;  %vm4813_vm2 = vcmp.eq.s32.totalorder %v3259_v35, %v3216_v27 }
 0x120   :  { %4900 = vst [vmem:[#allocation20_spill] sm:$0xff] %v3317_v14  ;;  %4901 = vst [vmem:[#allocation21_spill] sm:$0xff] %v3321_v15  ;;  %v3339_v14 = vrot.slane %v3292_v63, %v3043_v51  ;;  %v3342_v15 = vrot.slane %v2360_v44, %v3043_v51  ;;  %v3367_v44 = vmul.f32 %v3189_v16, %v3088_v52 }
 0x121   :  { %459 = vrot.lane.b32.xlu0 %v3110_v13, %s2737_s23  ;;  %4902 = vst [vmem:[#allocation22_spill] sm:$0xff] %v3325_v26  ;;  %4903 = vst [vmem:[#allocation23_spill] sm:$0xff] %v3328_v28  ;;  %v3349_v28 = vmul.f32 %v3198_v18, %v3071_v30  ;;  %v3401_v26 = vmul.f32 %v3192_v54, %v3132_v36  ;;  %vm4812_vm3 = vcmp.eq.s32.totalorder %v3259_v35, %v3219_v29 }
 0x122   :  { %475 = vrot.lane.b32.xlu1 %v3117_v19, %s2737_s23  ;;  %4904 = vst [vmem:[#allocation24_spill] sm:$0xff] %v3331_v40  ;;  %4905 = vst [vmem:[#allocation25_spill] sm:$0xff] %v3335_v4  ;;  %v3359_v4 = vmul.f32 %v3195_v17, %v3103_v8  ;;  %vm515_vm4 = vcmp.eq.s32.totalorder %v3263_v1, %v3216_v27  ;;  %vm575_vm5 = vcmp.eq.s32.totalorder %v3263_v1, %v3219_v29 }
 0x123   :  { %4906 = vst [vmem:[#allocation26_spill] sm:$0xff] %v3339_v14  ;;  %4907 = vst [vmem:[#allocation27_spill] sm:$0xff] %v3342_v15  ;;  %v3363_v14 = vmul.f32 %v3198_v18, %v3103_v8  ;;  %v3397_v15 = vmul.f32 %v3189_v16, %v3132_v36  ;;  %vm534_vm6 = vcmp.eq.s32.totalorder %v3267_v39, %v3222_v31 }
 0x124   :  { %4908 = vst [vmem:[#allocation28_spill] sm:$0xff] %v3345_v12  ;;  %4909 = vst [vmem:[#allocation29_spill] sm:$0xff] %v3349_v28  ;;  %v3371_v28 = vmul.f32 %v3192_v54, %v3088_v52  ;;  %v3431_v54 = vmul.f32 %v3201_v20, %v3152_v58  ;;  %vm594_vm7 = vcmp.eq.s32.totalorder %v3267_v39, %v3225_v32 }
 0x125   :  { %392 = vrot.lane.b32.xlu0 %v3128_v55, %s2736_s17  ;;  %4910 = vst [vmem:[#allocation30_spill] sm:$0xff] %v3353_v41  ;;  %4911 = vst [vmem:[#allocation31_spill] sm:$0xff] %v3359_v4  ;;  %v3377_v41 = vmul.f32 %v3201_v20, %v3082_v42  ;;  %v3381_v4 = vmul.f32 %v3201_v20, %v3110_v13  ;;  %vm516_vm8 = vcmp.eq.s32.totalorder %v3287_v62, %v3228_v23 }
 0x126   :  { %394 = vrot.lane.b32.xlu1 %v3132_v36, %s2736_s17  ;;  %4912 = vst [vmem:[#allocation32_spill] sm:$0xff] %v3363_v14  ;;  %4913 = vst [vmem:[#allocation33_spill] sm:$0xff] %v3367_v44  ;;  %v3385_v14 = vrot.slane %v3292_v63, %v3041_v50  ;;  %v3389_v44 = vmul.f32 %v3204_v21, %v3100_v2  ;;  %vm576_vm9 = vcmp.eq.s32.totalorder %v3287_v62, %v3234_v34 }
 0x127   :  { %4914 = vst [vmem:[#allocation34_spill] sm:$0xff] %v3371_v28  ;;  %4915 = vst [vmem:[#allocation35_spill] sm:$0xff] %v3381_v4  ;;  %v3393_v28 = vmul.f32 %v3204_v21, %v3117_v19  ;;  %v3405_v4 = vmul.f32 %v3189_v16, %v3128_v55  ;;  %v3427_v16 = vmul.f32 %v3198_v18, %v3140_v45 }
 0x128   :  { %4916 = vst [vmem:[#allocation36_spill] sm:$0xff] %v3385_v14  ;;  %4917 = vst [vmem:[#allocation37_spill] sm:$0xff] %v3389_v44  ;;  %v3413_v44 = vmul.f32 %v3195_v17, %v3142_v48  ;;  %vm514_vm10 = vcmp.eq.s32.totalorder %v3271_v56, %v3222_v31  ;;  %vm574_vm11 = vcmp.eq.s32.totalorder %v3271_v56, %v3225_v32 }
 0x129   :  { %469 = vrot.lane.b32.xlu0 %v3140_v45, %s2737_s23  ;;  %4918 = vst [vmem:[#allocation38_spill] sm:$0xff] %v3393_v28  ;;  %4919 = vst [vmem:[#allocation39_spill] sm:$0xff] %v3397_v15  ;;  %v3417_v28 = vmul.f32 %v3198_v18, %v3142_v48  ;;  %v3421_v15 = vmul.f32 %v3195_v17, %v3140_v45  ;;  %v3451_v18 = vmul.f32 %v3207_v22, %v3110_v13 }
 0x12a   :  { %471 = vrot.lane.b32.xlu1 %v3142_v48, %s2737_s23  ;;  %4920 = vst [vmem:[#allocation40_spill] sm:$0xff] %v3401_v26  ;;  %4921 = vst [vmem:[#allocation41_spill] sm:$0xff] %v3405_v4  ;;  %v3479_v4 = vmul.f32 %v3210_v24, %v3117_v19  ;;  %vm517_vm12 = vcmp.eq.s32.totalorder %v3283_v61, %v3231_v33  ;;  %vm577_vm13 = vcmp.eq.s32.totalorder %v3283_v61, %v3237_v37 }
 0x12b   :  { %4922 = vst [vmem:[#allocation42_spill] sm:$0xff] %v3409_v53  ;;  %4923 = vst [vmem:[#allocation43_spill] sm:$0xff] %v3413_v44  ;;  %v3435_v44 = vmul.f32 %v3201_v20, %v3154_v60  ;;  %v3455_v20 = vrot.slane %v3310_v11, %v3041_v50  ;;  %v3475_v53 = vmul.f32 %v3210_v24, %v3100_v2 }
 0x12c   :  { %4924 = vst [vmem:[#allocation44_spill] sm:$0xff] %v3417_v28  ;;  %4925 = vst [vmem:[#allocation45_spill] sm:$0xff] %v3421_v15  ;;  %v3439_v28 = vmul.f32 %v3207_v22, %v3082_v42  ;;  %v3463_v15 = vmul.f32 %v3207_v22, %v3154_v60  ;;  %vm536_vm14 = vcmp.eq.s32.totalorder %v3275_v57, %v3228_v23 }
 0x12d   :  { %453 = vrot.lane.b32.xlu0 %v3128_v55, %s2737_s23  ;;  %4926 = vst [vmem:[#allocation46_spill] sm:$0xff] %v3427_v16  ;;  %4927 = vst [vmem:[#allocation47_spill] sm:$0xff] %v3431_v54  ;;  %v3459_v16 = vmul.f32 %v3207_v22, %v3152_v58  ;;  %v3471_v54 = vmul.f32 %v3204_v21, %v3166_v5  ;;  %v3495_v22 = vmul.f32 %v3210_v24, %v3166_v5 }
 0x12e   :  { %455 = vrot.lane.b32.xlu1 %v3132_v36, %s2737_s23  ;;  %4928 = vst [vmem:[#allocation48_spill] sm:$0xff] %v3435_v44  ;;  %4930 = vst [vmem:[#allocation50_spill] sm:$0xff] %v3463_v15  ;;  %v3467_v44 = vmul.f32 %v3204_v21, %v3164_v3  ;;  %v3491_v21 = vmul.f32 %v3210_v24, %v3164_v3  ;;  %v3515_v24 = vmul.f32 %v3246_v46, %v3128_v55  ;;  %v3541_v55 = vld [vmem:[%s4788_s3 + $0x7] ss:$8 sm:$0xf] }
 0x12f   :  { %4929 = vst [vmem:[#allocation49_spill] sm:$0xff] %v3459_v16  ;;  %4932 = vst [vmem:[#allocation52_spill] sm:$0xff] %v3471_v54  ;;  %v3499_v54 = vmul.f32 %v3246_v46, %v3068_v25  ;;  %v3507_v16 = vmul.f32 %v3246_v46, %v3088_v52  ;;  %v3519_v25 = vmul.f32 %v3249_v47, %v3152_v58 }
 0x130   :  { %4931 = vst [vmem:[#allocation51_spill] sm:$0xff] %v3467_v44  ;;  %4933 = vst [vmem:[#allocation53_spill] sm:$0xff] %v3475_v53  ;;  %v3503_v44 = vmul.f32 %v3249_v47, %v3082_v42  ;;  %v3533_v52 = vrot.slane %v3292_v63, %v3057_v0  ;;  %v3553_v63 = vmul.f32 %v3246_v46, %v3132_v36 }
 0x131   :  { %400 = vrot.lane.b32.xlu0 %v3152_v58, %s2736_s17  ;;  %4934 = vst [vmem:[#allocation54_spill] sm:$0xff] %v3479_v4  ;;  %4935 = vst [vmem:[#allocation55_spill] sm:$0xff] %v3491_v21  ;;  %v3511_v21 = vmul.f32 %v3249_v47, %v3110_v13  ;;  %v2346_v13 = vld [vmem:[%s4788_s3 + $0x5] ss:$8 sm:$0xf]  ;;  %v3575_v36 = vmul.f32 %v3252_v38, %v3140_v45  ;;  %vm537_vm15 = vcmp.eq.s32.totalorder %v3279_v59, %v3231_v33 }
 0x132   :  { %402 = vrot.lane.b32.xlu1 %v3154_v60, %s2736_s17  ;;  %4936 = vst [vmem:[#allocation56_spill] sm:$0xff] %v3495_v22  ;;  %4937 = vst [vmem:[#allocation57_spill] sm:$0xff] %v3499_v54 }
 0x133   :  { %4938 = vst [vmem:[#allocation58_spill] sm:$0xff] %v3503_v44  ;;  %4939 = vst [vmem:[#allocation59_spill] sm:$0xff] %v3507_v16 }
 0x134   :  { %4940 = vst [vmem:[#allocation60_spill] sm:$0xff] %v3511_v21  ;;  %4941 = vst [vmem:[#allocation61_spill] sm:$0xff] %v3515_v24  ;;  %v3560_v24 = vmul.f32 %v3249_v47, %v3154_v60  ;;  %v3564_v21 = vmul.f32 %v3252_v38, %v3103_v8  ;;  %v3583_v8 = vmul.f32 %v3252_v38, %v3142_v48 }
 0x135   :  { %461 = vrot.lane.b32.xlu0 %v3152_v58, %s2737_s23  ;;  %4942 = vst [vmem:[#allocation62_spill] sm:$0xff] %v3519_v25  ;;  %4943 = vst [vmem:[#allocation63_spill] sm:$0xff] %v3533_v52  ;;  %v3545_v58 = vmul.f32 %v3252_v38, %v3071_v30  ;;  %v3556_v25 = vrot.slane %v2346_v13, %v3039_v49  ;;  %v3568_v30 = vmul.f32 %v3255_v43, %v3117_v19 }
 0x136   :  { %463 = vrot.lane.b32.xlu1 %v3154_v60, %s2737_s23  ;;  %4944 = vst [vmem:[#allocation64_spill] sm:$0xff] %v3541_v55  ;;  %4947 = vst [vmem:[#allocation67_spill] sm:$0xff] %v3553_v63  ;;  %v3579_v60 = vmul.f32 %v3255_v43, %v3164_v3  ;;  %v3587_v19 = vrot.slane %v3310_v11, %v3057_v0  ;;  %v3591_v47 = vrot.slane %v3541_v55, %v3039_v49 }
 0x137   :  { %4945 = vst [vmem:[#allocation65_spill] sm:$0xff] %v3545_v58  ;;  %4948 = vst [vmem:[#allocation68_spill] sm:$0xff] %v3556_v25 }
 0x138   :  { %4949 = vst [vmem:[#allocation69_spill] sm:$0xff] %v3560_v24  ;;  %4950 = vst [vmem:[#allocation70_spill] sm:$0xff] %v3564_v21 }
 0x139   :  { %416 = vrot.lane.b32.xlu0 %v3164_v3, %s2736_s17  ;;  %4951 = vst [vmem:[#allocation71_spill] sm:$0xff] %v3568_v30  ;;  %4952 = vst [vmem:[#allocation72_spill] sm:$0xff] %v3575_v36  ;;  %v3631_v30 = vrot.slane %v3541_v55, %v3043_v51 }
 0x13a   :  { %418 = vrot.lane.b32.xlu1 %v3166_v5, %s2736_s17  ;;  %4953 = vst [vmem:[#allocation73_spill] sm:$0xff] %v3579_v60  ;;  %4954 = vst [vmem:[#allocation74_spill] sm:$0xff] %v3583_v8  ;;  %v3611_v8 = vrot.slane %v2346_v13, %v3043_v51 }
 0x13b   :  { %4955 = vst [vmem:[#allocation75_spill] sm:$0xff] %v3587_v19  ;;  %4956 = vst [vmem:[#allocation76_spill] sm:$0xff] %v3591_v47 }
 0x13c   :  { %4959 = vst [vmem:[#allocation79_spill] sm:$0xff] %v3611_v8  ;;  %4960 = vst [vmem:[#allocation80_spill] sm:$0xff] %v3631_v30 }
 0x13d   :  { %408 = vrot.lane.b32.xlu0 %v3140_v45, %s2736_s17  ;;  %v3594_v45 = vrot.slane %v2346_v13, %v3041_v50 }
 0x13e   :  { %410 = vrot.lane.b32.xlu1 %v3142_v48, %s2736_s17 }
 0x13f   :  { %4957 = vst [vmem:[#allocation77_spill] sm:$0xff] %v3594_v45 }
 0x141   :  { %477 = vrot.lane.b32.xlu0 %v3164_v3, %s2737_s23  ;;  %v3598_v3 = vrot.slane %v3541_v55, %v3041_v50 }
 0x142   :  { %479 = vrot.lane.b32.xlu1 %v3166_v5, %s2737_s23  ;;  %v3549_v5 = vmul.f32 %v3255_v43, %v3100_v2 }
 0x143   :  { %4958 = vst [vmem:[#allocation78_spill] sm:$0xff] %v3598_v3 }
 0x144   :  { %4946 = vst [vmem:[#allocation66_spill] sm:$0xff] %v3549_v5 }
 0x177   :  { %v3355_v40 = vpop.permute.xlu0 %388 }
 0x178   :  { %v3373_v12 = vpop.permute.xlu1 %465 }
 0x17b   :  { %v3423_v26 = vpop.permute.xlu0 %449 }
 0x17c   :  { %v458_v17 = vpop.permute.xlu1 %457 }
 0x17d   :  { %v486_v2 = vsel %vm481_vm1, %v458_v17, %v3373_v12  ;;  %v490_v48 = vsel %vm481_vm1, %v3423_v26, %v458_v17 }
 0x17e   :  { %v539_v50 = vsel %vm4813_vm2, %v486_v2, 0.0  ;;  %v599_v17 = vsel %vm4812_vm3, %v486_v2, 0.0  ;;  %v3634_v2 = vrot.slane %v2346_v13, %v3057_v0  ;;  %vm4841_vm3 = vcmp.eq.s32.totalorder %v3275_v57, %v3234_v34 }
 0x17f   :  { %v405_v15 = vpop.permute.xlu0 %404  ;;  %vm4842_vm2 = vcmp.eq.s32.totalorder %v3279_v59, %v3237_v37 }
 0x180   :  { %v3529_v42 = vpop.permute.xlu1 %390  ;;  %4961 = vst [vmem:[#allocation81_spill] sm:$0xff] %v3634_v2 }
 0x183   :  { %v397_v46 = vpop.permute.xlu0 %396 }
 0x184   :  { %v3603_v38 = vpop.permute.xlu1 %451  ;;  %v425_v11 = vsel %vm420_vm0, %v397_v46, %v405_v15  ;;  %v429_v49 = vsel %vm420_vm0, %v3355_v40, %v397_v46 }
 0x185   :  { %v519_v43 = vsel %vm515_vm4, %v429_v49, 0.0  ;;  %v579_v60 = vsel %vm575_vm5, %v429_v49, 0.0  ;;  %v538_v49 = vsel %vm534_vm6, %v490_v48, 0.0  ;;  %v580_v13 = vsel %vm576_vm9, %v425_v11, 0.0 }
 0x186   :  { %v555_v46 = vadd.f32 %v539_v50, %v519_v43  ;;  %v615_v36 = vadd.f32 %v599_v17, %v579_v60  ;;  %v598_v50 = vsel %vm594_vm7, %v490_v48, 0.0  ;;  %v520_v43 = vsel %vm516_vm8, %v425_v11, 0.0 }
 0x187   :  { %v413_v60 = vpop.permute.xlu0 %412 }
 0x188   :  { %v807_v17 = vmul.f32 %v3295_v6, %v555_v46  ;;  %v1167_v51 = vmul.f32 %v3298_v7, %v555_v46  ;;  %v407_v21 = vpop.permute.xlu1 %406  ;;  %v421_v24 = vsel %vm420_vm0, %v405_v15, %v413_v60  ;;  %v433_v48 = vsel %vm420_vm0, %v413_v60, %v3355_v40 }
 0x189   :  { %v518_v63 = vsel %vm514_vm10, %v433_v48, 0.0  ;;  %v521_v11 = vsel %vm517_vm12, %v421_v24, 0.0  ;;  %v578_v5 = vsel %vm574_vm11, %v433_v48, 0.0  ;;  %v581_v15 = vsel %vm577_vm13, %v421_v24, 0.0 }
 0x18a   :  { %v3671_v30 = vadd.f32 %v538_v49, %v518_v63  ;;  %v3673_v58 = vadd.f32 %v598_v50, %v578_v5  ;;  %v3676_v40 = vadd.f32 %v3377_v41, %v807_v17  ;;  %v3679_v60 = vmul.f32 %v3385_v14, %v615_v36  ;;  %v4966_v41 = vld [vmem:[#allocation18_spill] sm:$0xff]  ;;  %v4967_v49 = vld [vmem:[#allocation19_spill] sm:$0xff] }
 0x18b   :  { %v474_v2 = vpop.permute.xlu0 %473  ;;  %v3682_v8 = vadd.f32 %v3439_v28, %v1167_v51  ;;  %v3685_v48 = vmul.f32 %v3455_v20, %v615_v36  ;;  %v3688_v55 = vmul.f32 %v3594_v45, %v555_v46  ;;  %v3691_v24 = vmul.f32 %v3598_v3, %v615_v36  ;;  %v4968_v28 = vld [vmem:[#allocation20_spill] sm:$0xff]  ;;  %v4969_v45 = vld [vmem:[#allocation21_spill] sm:$0xff] }
 0x18c   :  { %4962 = vst [vmem:[#allocation82_spill] sm:$0xff] %v3671_v30  ;;  %4963 = vst [vmem:[#allocation83_spill] sm:$0xff] %v3673_v58  ;;  %v806_v5 = vmul.f32 %v3301_v10, %v3671_v30  ;;  %v3697_v63 = vmul.f32 %v4966_v41, %v3673_v58  ;;  %v1166_v51 = vmul.f32 %v4967_v49, %v3671_v30  ;;  %v399_v17 = vpop.permute.xlu1 %398  ;;  %v4983_v30 = vld [vmem:[#allocation25_spill] sm:$0xff] }
 0x18d   :  { %4964 = vst [vmem:[#allocation84_spill] sm:$0xff] %v3688_v55  ;;  %4965 = vst [vmem:[#allocation85_spill] sm:$0xff] %v3691_v24  ;;  %v3703_v50 = vmul.f32 %v4968_v28, %v3673_v58  ;;  %v426_v46 = vsel %vm420_vm0, %v399_v17, %v407_v21  ;;  %v430_v36 = vsel %vm420_vm0, %v3529_v42, %v399_v17  ;;  %v4970_v24 = vld [vmem:[#allocation22_spill] sm:$0xff] }
 0x18e   :  { %v482_v0 = vsel %vm481_vm1, %v3373_v12, %v474_v2  ;;  %v494_v3 = vsel %vm481_vm1, %v474_v2, %v3423_v26  ;;  %v3717_v16 = vadd.f32 %v4969_v45, %v806_v5  ;;  %v3720_v44 = vadd.f32 %v4970_v24, %v1166_v51 }
 0x18f   :  { %v523_v55 = vsel %vm515_vm4, %v430_v36, 0.0  ;;  %v524_v17 = vsel %vm516_vm8, %v426_v46, 0.0  ;;  %v583_v12 = vsel %vm575_vm5, %v430_v36, 0.0  ;;  %v584_v26 = vsel %vm576_vm9, %v426_v46, 0.0  ;;  %v468_v24 = vpop.permute.xlu0 %467 }
 0x190   :  { %v540_v45 = vsel %vm536_vm14, %v482_v0, 0.0  ;;  %v541_v2 = vsel %vm537_vm15, %v494_v3, 0.0  ;;  %v600_v36 = vsel %vm4841_vm3, %v482_v0, 0.0  ;;  %v601_v46 = vsel %vm4842_vm2, %v494_v3, 0.0  ;;  %v415_v54 = vpop.permute.xlu1 %414  ;;  %v4976_v0 = vld [vmem:[#allocation24_spill] sm:$0xff]  ;;  %v4977_v3 = vld [vmem:[#allocation27_spill] sm:$0xff] }
 0x191   :  { %v3740_v5 = vadd.f32 %v540_v45, %v520_v43  ;;  %v3742_v51 = vadd.f32 %v541_v2, %v521_v11  ;;  %v3750_v22 = vadd.f32 %v600_v36, %v580_v13  ;;  %v3752_v62 = vadd.f32 %v601_v46, %v581_v15  ;;  %v4975_v11 = vld [vmem:[#allocation23_spill] sm:$0xff]  ;;  %v4978_v13 = vld [vmem:[#allocation28_spill] sm:$0xff]  ;;  %v4980_v36 = vld [vmem:[#allocation26_spill] sm:$0xff] }
 0x192   :  { %v422_v47 = vsel %vm420_vm0, %v407_v21, %v415_v54  ;;  %v434_v43 = vsel %vm420_vm0, %v415_v54, %v3529_v42  ;;  %v4981_v46 = vld [vmem:[#allocation30_spill] sm:$0xff] }
 0x193   :  { %4971 = vst [vmem:[#allocation18_spill] sm:$0xff] %v3740_v5  ;;  %4972 = vst [vmem:[#allocation19_spill] sm:$0xff] %v3742_v51  ;;  %v808_v45 = vmul.f32 %v4975_v11, %v3740_v5  ;;  %v809_v2 = vmul.f32 %v4976_v0, %v3742_v51  ;;  %v1168_v58 = vmul.f32 %v4977_v3, %v3740_v5  ;;  %v522_v54 = vsel %vm514_vm10, %v434_v43, 0.0  ;;  %v460_v5 = vpop.permute.xlu0 %459 }
 0x194   :  { %4973 = vst [vmem:[#allocation20_spill] sm:$0xff] %v3750_v22  ;;  %4974 = vst [vmem:[#allocation21_spill] sm:$0xff] %v3752_v62  ;;  %v3767_v15 = vmul.f32 %v4978_v13, %v3742_v51  ;;  %v902_v21 = vmul.f32 %v4980_v36, %v3750_v22  ;;  %v3773_v25 = vmul.f32 %v4981_v46, %v3750_v22  ;;  %v525_v42 = vsel %vm517_vm12, %v422_v47, 0.0  ;;  %v4984_v51 = vld [vmem:[#allocation29_spill] sm:$0xff] }
 0x195   :  { %v863_v1 = vadd.f32 %v4983_v30, %v808_v45  ;;  %v3783_v19 = vadd.f32 %v4984_v51, %v1168_v58  ;;  %v582_v4 = vsel %vm574_vm11, %v434_v43, 0.0  ;;  %v585_v22 = vsel %vm577_vm13, %v422_v47, 0.0 }
 0x196   :  { %4979 = vst [vmem:[#allocation22_spill] sm:$0xff] %v3767_v15  ;;  %4982 = vst [vmem:[#allocation86_spill] sm:$0xff] %v3773_v25  ;;  %v476_v25 = vpop.permute.xlu1 %475  ;;  %v487_v58 = vsel %vm481_vm1, %v460_v5, %v468_v24  ;;  %v491_v30 = vsel %vm481_vm1, %v3603_v38, %v460_v5 }
 0x197   :  { %v483_v53 = vsel %vm481_vm1, %v468_v24, %v476_v25  ;;  %v495_v15 = vsel %vm481_vm1, %v476_v25, %v3603_v38  ;;  %v3821_v61 = vpop.permute.xlu0 %392  ;;  %v542_v33 = vsel %vm534_vm6, %v491_v30, 0.0 }
 0x198   :  { %v544_v51 = vsel %vm536_vm14, %v483_v53, 0.0  ;;  %v545_v47 = vsel %vm537_vm15, %v495_v15, 0.0  ;;  %v604_v43 = vsel %vm4841_vm3, %v483_v53, 0.0  ;;  %v605_v25 = vsel %vm4842_vm2, %v495_v15, 0.0 }
 0x199   :  { %v3813_v24 = vadd.f32 %v544_v51, %v524_v17  ;;  %v3815_v45 = vadd.f32 %v545_v47, %v525_v42  ;;  %v3817_v38 = vadd.f32 %v604_v43, %v584_v26  ;;  %v3819_v5 = vadd.f32 %v605_v25, %v585_v22 }
 0x19a   :  { %vm4989_vm3 = vcmp.eq.s32.totalorder %v3259_v35, %v3216_v27  ;;  %v602_v17 = vsel %vm594_vm7, %v491_v30, 0.0  ;;  %vm4990_vm2 = vcmp.eq.s32.totalorder %v3259_v35, %v3219_v29  ;;  %v3835_v22 = vpop.permute.xlu1 %394  ;;  %v3851_v43 = vadd.f32 %v542_v33, %v522_v54 }
 0x19b   :  { %4985 = vst [vmem:[#allocation25_spill] sm:$0xff] %v3813_v24  ;;  %4986 = vst [vmem:[#allocation29_spill] sm:$0xff] %v3815_v45  ;;  %v543_v53 = vsel %vm4989_vm3, %v487_v58, 0.0  ;;  %v603_v26 = vsel %vm4990_vm2, %v487_v58, 0.0  ;;  %v812_v15 = vmul.f32 %v4975_v11, %v3813_v24  ;;  %v813_v42 = vmul.f32 %v4976_v0, %v3815_v45  ;;  %v4993_v11 = vld [vmem:[#allocation31_spill] sm:$0xff]  ;;  %v4994_v0 = vld [vmem:[#allocation32_spill] sm:$0xff] }
 0x19c   :  { %4987 = vst [vmem:[#allocation87_spill] sm:$0xff] %v3817_v38  ;;  %4988 = vst [vmem:[#allocation88_spill] sm:$0xff] %v3819_v5  ;;  %v906_v51 = vmul.f32 %v4980_v36, %v3817_v38  ;;  %v1172_v47 = vmul.f32 %v4977_v3, %v3813_v24  ;;  %v1173_v30 = vmul.f32 %v4978_v13, %v3815_v45  ;;  %v3861_v24 = vpop.permute.xlu0 %469  ;;  %v5000_v3 = vld [vmem:[#allocation38_spill] sm:$0xff] }
 0x19d   :  { %v3849_v58 = vmul.f32 %v4981_v46, %v3817_v38  ;;  %4991 = vst [vmem:[#allocation89_spill] sm:$0xff] %v3851_v43  ;;  %v3853_v25 = vadd.f32 %v543_v53, %v523_v55  ;;  %v867_v59 = vadd.f32 %v4993_v11, %v812_v15  ;;  %v3857_v37 = vadd.f32 %v602_v17, %v582_v4  ;;  %v4996_v53 = vld [vmem:[#allocation33_spill] sm:$0xff]  ;;  %vm5013_vm2 = vmmov %vm4989_vm3 }
 0x19e   :  { %v1227_v57 = vadd.f32 %v4994_v0, %v1172_v47  ;;  %v3859_v36 = vadd.f32 %v603_v26, %v583_v12  ;;  %v810_v45 = vmul.f32 %v3301_v10, %v3851_v43  ;;  %v1170_v33 = vmul.f32 %v4967_v49, %v3851_v43  ;;  %v3871_v11 = vpop.permute.xlu1 %471  ;;  %v4997_v26 = vld [vmem:[#allocation34_spill] sm:$0xff]  ;;  %v4998_v47 = vld [vmem:[#allocation35_spill] sm:$0xff]  ;;  %v4999_v43 = vld [vmem:[#allocation37_spill] sm:$0xff] }
 0x19f   :  { %4992 = vst [vmem:[#allocation90_spill] sm:$0xff] %v3853_v25  ;;  %4995 = vst [vmem:[#allocation31_spill] sm:$0xff] %v3857_v37  ;;  %v811_v38 = vmul.f32 %v3295_v6, %v3853_v25  ;;  %v1171_v55 = vmul.f32 %v3298_v7, %v3853_v25  ;;  %v904_v4 = vmul.f32 %v4966_v41, %v3857_v37 }
 0x1a0   :  { %v1264_v12 = vmul.f32 %v4968_v28, %v3857_v37  ;;  %v905_v0 = vmul.f32 %v3385_v14, %v3859_v36  ;;  %v917_v54 = vadd.f32 %v3679_v60, %v3676_v40  ;;  %v865_v17 = vadd.f32 %v4996_v53, %v810_v45  ;;  %v3885_v13 = vpop.permute.xlu0 %453  ;;  %vm5014_vm3 = vmmov %vm5013_vm2 }
 0x1a1   :  { %v1225_v15 = vadd.f32 %v4997_v26, %v1170_v33  ;;  %v866_v25 = vadd.f32 %v4998_v47, %v811_v38  ;;  %v864_v46 = vadd.f32 %v4999_v43, %v809_v2  ;;  %v868_v34 = vadd.f32 %v5000_v3, %v813_v42 }
 0x1a2   :  { %v903_v37 = vmul.f32 %v3533_v52, %v3752_v62  ;;  %v907_v14 = vmul.f32 %v3533_v52, %v3819_v5  ;;  %v916_v40 = vadd.f32 %v3697_v63, %v3717_v16  ;;  %v3894_v60 = vpop.permute.xlu1 %455  ;;  %v920_v33 = vadd.f32 %v904_v4, %v865_v17 }
 0x1a3   :  { %v921_v45 = vadd.f32 %v905_v0, %v866_v25  ;;  %v918_v38 = vadd.f32 %v902_v21, %v863_v1  ;;  %v922_v53 = vadd.f32 %v906_v51, %v867_v59  ;;  %v1226_v26 = vadd.f32 %v3451_v18, %v1171_v55  ;;  %v5002_v18 = vld [vmem:[#allocation53_spill] sm:$0xff] }
 0x1a4   :  { %v919_v2 = vadd.f32 %v903_v37, %v864_v46  ;;  %v923_v43 = vadd.f32 %v907_v14, %v868_v34  ;;  %v1265_v3 = vmul.f32 %v3455_v20, %v3859_v36  ;;  %v2569_v47 = vpack.c.bf16 %v920_v33, %v916_v40  ;;  %v3903_v63 = vpop.permute.xlu0 %400  ;;  %v5001_v14 = vld [vmem:[#allocation22_spill] sm:$0xff]  ;;  %v5004_v46 = vld [vmem:[#allocation75_spill] sm:$0xff] }
 0x1a5   :  { %v2567_v42 = vpack.c.bf16 %v921_v45, %v917_v54  ;;  %v2577_v23 = vpack.c.bf16 %v922_v53, %v918_v38  ;;  %v3901_v52 = vadd.f32 %v3685_v48, %v3682_v8  ;;  %v3909_v34 = vadd.f32 %v3703_v50, %v3720_v44  ;;  %v5003_v48 = vld [vmem:[#allocation54_spill] sm:$0xff]  ;;  %v5010_v53 = vld [vmem:[#allocation68_spill] sm:$0xff] }
 0x1a6   :  { %v2575_v16 = vpack.c.bf16 %v923_v43, %v919_v2  ;;  %v3905_v25 = vadd.f32 %v1265_v3, %v1226_v26  ;;  %v3911_v37 = vadd.f32 %v1264_v12, %v1225_v15  ;;  %v3913_v1 = vpop.permute.xlu1 %402  ;;  %v431_v59 = vsel %vm420_vm0, %v3821_v61, %v3903_v63  ;;  %v5006_v45 = vld [vmem:[#allocation86_spill] sm:$0xff] }
 0x1a7   :  { %2568 = vmatprep.subr.bf16.mxu0 %v2567_v42  ;;  %v1224_v8 = vadd.f32 %v5002_v18, %v5001_v14  ;;  %v1228_v21 = vadd.f32 %v5003_v48, %v1173_v30  ;;  %v1263_v51 = vmul.f32 %v5004_v46, %v3752_v62  ;;  %v432_v44 = vsel %vm420_vm0, %v3835_v22, %v3913_v1  ;;  %v5009_v38 = vld [vmem:[#allocation82_spill] sm:$0xff]  ;;  %v5039_v62 = vld [vmem:[#allocation48_spill] sm:$0xff] }
 0x1a8   :  { %2576 = vmatprep.subr.bf16.mxu1 %v2575_v16  ;;  %2570 = vmatpush1.bf16.msra.mxu0 %v2569_v47  ;;  %v527_v55 = vsel %vm515_vm4, %v431_v59, 0.0  ;;  %v587_v4 = vsel %vm575_vm5, %v431_v59, 0.0  ;;  %v531_v12 = vsel %vm515_vm4, %v432_v44, 0.0  ;;  %v591_v0 = vsel %vm575_vm5, %v432_v44, 0.0  ;;  %v462_v15 = vpop.permute.xlu0 %461  ;;  %v5012_v47 = vld [vmem:[#allocation76_spill] sm:$0xff]  ;;  %v5031_v54 = vld [vmem:[#allocation14_spill] sm:$0xff] }
 0x1a9   :  { %2578 = vmatpush1.bf16.msra.mxu1 %v2577_v23  ;;  %v1267_v17 = vmul.f32 %v5004_v46, %v3819_v5  ;;  %v3946_v40 = vadd.f32 %v1263_v51, %v1224_v8  ;;  %v3950_v23 = vadd.f32 %v5006_v45, %v3783_v19  ;;  %v3953_v33 = vadd.f32 %v3849_v58, %v1227_v57  ;;  %v5011_v19 = vld [vmem:[#allocation83_spill] sm:$0xff] }
 0x1aa   :  { %v3957_v2 = vmul.f32 %v5010_v53, %v5009_v38  ;;  %v464_v43 = vpop.permute.xlu1 %463  ;;  %v488_v26 = vsel %vm481_vm1, %v462_v15, %v3861_v24  ;;  %v492_v3 = vsel %vm481_vm1, %v3885_v13, %v462_v15  ;;  %v3969_v16 = vmul.f32 %v5012_v47, %v5011_v19  ;;  %v5032_v5 = vld [vmem:[#allocation15_spill] sm:$0xff] }
 0x1ab   :  { %5007 = vst [vmem:[#allocation32_spill] sm:$0xff] %v3950_v23  ;;  %5008 = vst [vmem:[#allocation33_spill] sm:$0xff] %v3953_v33  ;;  %v3965_v42 = vadd.f32 %v1267_v17, %v1228_v21  ;;  %v489_v57 = vsel %vm481_vm1, %v464_v43, %v3871_v11  ;;  %v493_v58 = vsel %vm481_vm1, %v3894_v60, %v464_v43  ;;  %v546_v59 = vsel %vm534_vm6, %v492_v3, 0.0  ;;  %v5047_v23 = vld [vmem:[#allocation44_spill] sm:$0xff] }
 0x1ac   :  { %v547_v14 = vsel %vm5013_vm2, %v488_v26, 0.0  ;;  %v550_v18 = vsel %vm534_vm6, %v493_v58, 0.0  ;;  %v551_v8 = vsel %vm5014_vm3, %v489_v57, 0.0  ;;  %v610_v48 = vsel %vm594_vm7, %v493_v58, 0.0  ;;  %v417_v27 = vpop.permute.xlu0 %416 }
 0x1ad   :  { %vm5015_vm4 = vcmp.eq.s32.totalorder %v3259_v35, %v3219_v29  ;;  %v3995_v51 = vadd.f32 %v551_v8, %v531_v12  ;;  %v3999_v50 = vadd.f32 %v547_v14, %v527_v55  ;;  %v606_v17 = vsel %vm594_vm7, %v492_v3, 0.0 }
 0x1ae   :  { %v611_v21 = vsel %vm5015_vm4, %v489_v57, 0.0  ;;  %vm5017_vm5 = vmmov %vm5015_vm4  ;;  %v419_v45 = vpop.permute.xlu1 %418  ;;  %v435_v38 = vsel %vm420_vm0, %v417_v27, %v3821_v61 }
 0x1af   :  { %5016 = vst [vmem:[#allocation34_spill] sm:$0xff] %v3995_v51  ;;  %v3997_v44 = vadd.f32 %v611_v21, %v591_v0  ;;  %v607_v15 = vsel %vm5017_vm5, %v488_v26, 0.0  ;;  %v819_v39 = vmul.f32 %v3295_v6, %v3995_v51  ;;  %v4018_v0 = vmul.f32 %v3298_v7, %v3995_v51 }
 0x1b0   :  { %v4020_v29 = vadd.f32 %v607_v15, %v587_v4  ;;  %v815_v35 = vmul.f32 %v3295_v6, %v3999_v50  ;;  %v4026_v61 = vmul.f32 %v3298_v7, %v3999_v50  ;;  %v436_v43 = vsel %vm420_vm0, %v419_v45, %v3835_v22  ;;  %v409_v22 = vpop.permute.xlu0 %408 }
 0x1b1   :  { %v526_v26 = vsel %vm514_vm10, %v435_v38, 0.0  ;;  %v586_v4 = vsel %vm574_vm11, %v435_v38, 0.0  ;;  %v530_v6 = vsel %vm514_vm10, %v436_v43, 0.0  ;;  %v590_v7 = vsel %vm574_vm11, %v436_v43, 0.0  ;;  %v5022_v38 = vld [vmem:[#allocation42_spill] sm:$0xff] }
 0x1b2   :  { %v4043_v3 = vadd.f32 %v546_v59, %v526_v26  ;;  %v4045_v19 = vadd.f32 %v606_v17, %v586_v4  ;;  %v4047_v57 = vadd.f32 %v550_v18, %v530_v6  ;;  %v4049_v58 = vadd.f32 %v610_v48, %v590_v7  ;;  %v411_v14 = vpop.permute.xlu1 %410  ;;  %v5024_v6 = vld [vmem:[#allocation40_spill] sm:$0xff] }
 0x1b3   :  { %v423_v8 = vsel %vm420_vm0, %v409_v22, %v417_v27  ;;  %v427_v31 = vsel %vm420_vm0, %v3903_v63, %v409_v22  ;;  %v5021_v27 = vld [vmem:[#allocation41_spill] sm:$0xff]  ;;  %v424_v26 = vsel %vm420_vm0, %v411_v14, %v419_v45  ;;  %v5029_v45 = vld [vmem:[#allocation10_spill] sm:$0xff]  ;;  %vm2740_vm10 = vmmov 0  }
 0x1b4   :  { %5018 = vst [vmem:[#allocation35_spill] sm:$0xff] %v4045_v19  ;;  %5019 = vst [vmem:[#allocation37_spill] sm:$0xff] %v4047_v57  ;;  %v814_v32 = vmul.f32 %v3301_v10, %v4043_v3  ;;  %v4060_v56 = vmul.f32 %v4966_v41, %v4045_v19  ;;  %v1174_v59 = vmul.f32 %v4967_v49, %v4043_v3  ;;  %v478_v12 = vpop.permute.xlu0 %477  ;;  %vm1895_vm11 = vcmask 64512  }
 0x1b5   :  { %5020 = vst [vmem:[#allocation38_spill] sm:$0xff] %v4049_v58  ;;  %v4066_v18 = vmul.f32 %v4968_v28, %v4045_v19  ;;  %v818_v48 = vmul.f32 %v3301_v10, %v4047_v57  ;;  %v4072_v63 = vmul.f32 %v4966_v41, %v4049_v58  ;;  %v1178_v21 = vmul.f32 %v4967_v49, %v4047_v57  ;;  %v5023_v41 = vld [vmem:[#allocation39_spill] sm:$0xff] }
 0x1b6   :  { %v4078_v17 = vmul.f32 %v4968_v28, %v4049_v58  ;;  %v869_v15 = vadd.f32 %v5021_v27, %v814_v32  ;;  %v4082_v43 = vadd.f32 %v5022_v38, %v1174_v59  ;;  %v428_v10 = vsel %vm420_vm0, %v3913_v1, %v411_v14  ;;  %v480_v38 = vpop.permute.xlu1 %479  ;;  %v5030_v1 = vld [vmem:[#allocation11_spill] sm:$0xff] }
 0x1b7   :  { %v873_v4 = vadd.f32 %v5023_v41, %v818_v48  ;;  %v4091_v49 = vadd.f32 %v5024_v6, %v1178_v21  ;;  %v532_v22 = vsel %vm516_vm8, %v428_v10, 0.0  ;;  %v533_v59 = vsel %vm517_vm12, %v424_v26, 0.0  ;;  %v5038_v58 = vld [vmem:[#allocation47_spill] sm:$0xff] }
 0x1b8   :  { %v592_v55 = vsel %vm576_vm9, %v428_v10, 0.0  ;;  %v593_v14 = vsel %vm577_vm13, %v424_v26, 0.0  ;;  %v528_v48 = vsel %vm516_vm8, %v427_v31, 0.0  ;;  %v529_v21 = vsel %vm517_vm12, %v423_v8, 0.0 }
 0x1b9   :  { %v588_v41 = vsel %vm576_vm9, %v427_v31, 0.0  ;;  %v589_v10 = vsel %vm577_vm13, %v423_v8, 0.0  ;;  %v485_v26 = vsel %vm481_vm1, %v3871_v11, %v480_v38  ;;  %v497_v6 = vsel %vm481_vm1, %v480_v38, %v3894_v60 }
 0x1ba   :  { %v552_v30 = vsel %vm536_vm14, %v485_v26, 0.0  ;;  %v553_v31 = vsel %vm537_vm15, %v497_v6, 0.0  ;;  %vm5033_vm6 = vcmp.eq.s32.totalorder %v5031_v54, %v5029_v45  ;;  %vm5034_vm7 = vcmp.eq.s32.totalorder %v5032_v5, %v5030_v1 }
 0x1bb   :  { %v612_v8 = vsel %vm5033_vm6, %v485_v26, 0.0  ;;  %v613_v11 = vsel %vm5034_vm7, %v497_v6, 0.0  ;;  %v4135_v7 = vadd.f32 %v552_v30, %v532_v22  ;;  %v4137_v60 = vadd.f32 %v553_v31, %v533_v59  ;;  %v5040_v30 = vld [vmem:[#allocation23_spill] sm:$0xff]  ;;  %vm5049_vm8 = vmmov %vm5034_vm7 }
 0x1bc   :  { %v4139_v32 = vadd.f32 %v612_v8, %v592_v55  ;;  %v4141_v38 = vadd.f32 %v613_v11, %v593_v14  ;;  %v484_v51 = vsel %vm481_vm1, %v3861_v24, %v478_v12  ;;  %v496_v26 = vsel %vm481_vm1, %v478_v12, %v3885_v13  ;;  %v5041_v55 = vld [vmem:[#allocation24_spill] sm:$0xff]  ;;  %v5042_v14 = vld [vmem:[#allocation26_spill] sm:$0xff]  ;;  %v5043_v8 = vld [vmem:[#allocation27_spill] sm:$0xff] }
 0x1bd   :  { %5035 = vst [vmem:[#allocation22_spill] sm:$0xff] %v4135_v7  ;;  %5036 = vst [vmem:[#allocation53_spill] sm:$0xff] %v4137_v60  ;;  %v870_v57 = vadd.f32 %v5038_v58, %v815_v35  ;;  %v874_v6 = vadd.f32 %v5039_v62, %v819_v39  ;;  %v820_v22 = vmul.f32 %v5040_v30, %v4135_v7  ;;  %v5044_v11 = vld [vmem:[#allocation28_spill] sm:$0xff]  ;;  %v5045_v13 = vld [vmem:[#allocation30_spill] sm:$0xff]  ;;  %v548_v62 = vsel %vm536_vm14, %v484_v51, 0.0 }
 0x1be   :  { %5037 = vst [vmem:[#allocation54_spill] sm:$0xff] %v4139_v32  ;;  %v821_v59 = vmul.f32 %v5041_v55, %v4137_v60  ;;  %v914_v31 = vmul.f32 %v5042_v14, %v4139_v32  ;;  %v1180_v24 = vmul.f32 %v5043_v8, %v4135_v7  ;;  %v1181_v9 = vmul.f32 %v5044_v11, %v4137_v60  ;;  %v5046_v35 = vld [vmem:[#allocation43_spill] sm:$0xff]  ;;  %vm5048_vm1 = vmmov %vm5033_vm6  ;;  %v5050_v60 = vld [vmem:[#allocation36_spill] sm:$0xff] }
 0x1bf   :  { %v1274_v12 = vmul.f32 %v5045_v13, %v4139_v32  ;;  %v549_v39 = vsel %vm537_vm15, %v496_v26, 0.0  ;;  %v875_v58 = vadd.f32 %v5046_v35, %v820_v22  ;;  %v4171_v19 = vadd.f32 %v548_v62, %v528_v48  ;;  %v5053_v62 = vld [vmem:[#allocation49_spill] sm:$0xff] }
 0x1c0   :  { %v1235_v33 = vadd.f32 %v5047_v23, %v1180_v24  ;;  %v4173_v7 = vadd.f32 %v549_v39, %v529_v21  ;;  %v608_v32 = vsel %vm5048_vm1, %v484_v51, 0.0  ;;  %v609_v28 = vsel %vm5049_vm8, %v496_v26, 0.0 }
 0x1c1   :  { %v909_v27 = vmul.f32 %v5050_v60, %v4020_v29  ;;  %v913_v22 = vmul.f32 %v5050_v60, %v3997_v44  ;;  %vm932_vm9 = vcmask 261120   ;;  %v4185_v23 = vadd.f32 %v608_v32, %v588_v41  ;;  %v5051_v60 = vld [vmem:[#allocation45_spill] sm:$0xff] }
 0x1c2   :  { %v4187_v48 = vadd.f32 %v609_v28, %v589_v10  ;;  %v816_v21 = vmul.f32 %v5040_v30, %v4171_v19  ;;  %v817_v54 = vmul.f32 %v5041_v55, %v4173_v7  ;;  %v1176_v5 = vmul.f32 %v5043_v8, %v4171_v19  ;;  %v5052_v30 = vld [vmem:[#allocation46_spill] sm:$0xff] }
 0x1c3   :  { %v1177_v51 = vmul.f32 %v5044_v11, %v4173_v7  ;;  %v925_v45 = vadd.f32 %v909_v27, %v870_v57  ;;  %v929_v1 = vadd.f32 %v913_v22, %v874_v6  ;;  %v910_v41 = vmul.f32 %v5042_v14, %v4185_v23  ;;  %v5054_v57 = vld [vmem:[#allocation50_spill] sm:$0xff] }
 0x1c4   :  { %v871_v26 = vadd.f32 %v5051_v60, %v816_v21  ;;  %v1270_v10 = vmul.f32 %v5045_v13, %v4185_v23  ;;  %v924_v32 = vadd.f32 %v4060_v56, %v869_v15  ;;  %v1231_v55 = vadd.f32 %v5052_v30, %v1176_v5  ;;  %v5055_v13 = vld [vmem:[#allocation51_spill] sm:$0xff]  ;;  %v5056_v15 = vld [vmem:[#allocation52_spill] sm:$0xff]  ;;  %v779_v21 = vld [vmem:[%s4789_s6] sm:$0xff] }
 0x1c5   :  { %v2571_v24 = vpack.c.bf16 %v929_v1, %v925_v45  ;;  %v928_v8 = vadd.f32 %v4072_v63, %v873_v4  ;;  %v1230_v11 = vadd.f32 %v5053_v62, %v4026_v61  ;;  %v1234_v6 = vadd.f32 %v5054_v57, %v4018_v0  ;;  %v5057_v63 = vld [vmem:[#allocation63_spill] sm:$0xff] }
 0x1c6   :  { %v1269_v39 = vmul.f32 %v3455_v20, %v4020_v29  ;;  %v1273_v14 = vmul.f32 %v3455_v20, %v3997_v44  ;;  %v872_v35 = vadd.f32 %v5055_v13, %v817_v54  ;;  %v876_v28 = vadd.f32 %v5056_v15, %v821_v59  ;;  %v5059_v30 = vld [vmem:[#allocation55_spill] sm:$0xff]  ;;  %v5071_v15 = vld [vmem:[#allocation77_spill] sm:$0xff] }
 0x1c7   :  { %2572 = vmatprep.subr.bf16.mxu0 %v2571_v24  ;;  %v2573_v56 = vpack.c.bf16 %v928_v8, %v924_v32  ;;  %v911_v4 = vmul.f32 %v5057_v63, %v4187_v48  ;;  %v915_v61 = vmul.f32 %v5057_v63, %v4141_v38  ;;  %v1284_v22 = vadd.f32 %v4066_v18, %v4082_v43  ;;  %v5060_v43 = vld [vmem:[#allocation56_spill] sm:$0xff]  ;;  %v5069_v13 = vld [vmem:[#allocation31_spill] sm:$0xff] }
 0x1c8   :  { %v1285_v27 = vadd.f32 %v1269_v39, %v1230_v11  ;;  %v1289_v0 = vadd.f32 %v1273_v14, %v1234_v6  ;;  %v1288_v20 = vadd.f32 %v4078_v17, %v4091_v49  ;;  %v926_v5 = vadd.f32 %v910_v41, %v871_v26  ;;  %v5062_v26 = vld [vmem:[#allocation84_spill] sm:$0xff]  ;;  %v5063_v41 = vld [vmem:[#allocation58_spill] sm:$0xff]  ;;  %v5068_v39 = vld [vmem:[#allocation59_spill] sm:$0xff] }
 0x1c9   :  { %2574 = vmatpush1.bf16.msra.mxu0 %v2573_v56  ;;  %v927_v59 = vadd.f32 %v911_v4, %v872_v35  ;;  %v931_v54 = vadd.f32 %v915_v61, %v876_v28  ;;  %v930_v45 = vadd.f32 %v914_v31, %v875_v58  ;;  %v5058_v1 = vpack.c.bf16 %v3905_v25, %v3901_v52  ;;  %v5061_v52 = vld [vmem:[#allocation57_spill] sm:$0xff]  ;;  %v5070_v56 = vld [vmem:[#allocation90_spill] sm:$0xff] }
 0x1ca   :  { %v2587_v60 = vpack.c.bf16 %v1289_v0, %v1285_v27  ;;  %v2589_v32 = vpack.c.bf16 %v1288_v20, %v1284_v22  ;;  %v1232_v18 = vadd.f32 %v5059_v30, %v1177_v51  ;;  %v1236_v24 = vadd.f32 %v5060_v43, %v1181_v9  ;;  %v5074_v27 = vld [vmem:[#allocation6_spill] sm:$0xff]  ;;  %v5075_v0 = vld [vmem:[#allocation64_spill] sm:$0xff] }
 0x1cb   :  { %2584 = vmatprep.subr.bf16.mxu0 %v5058_v1  ;;  %v2579_v17 = vpack.c.bf16 %v931_v54, %v927_v59  ;;  %v2581_v49 = vpack.c.bf16 %v930_v45, %v926_v5  ;;  %v1271_v8 = vmul.f32 %v5004_v46, %v4187_v48  ;;  %v1275_v62 = vmul.f32 %v5004_v46, %v4141_v38  ;;  %v780_v46 = vld [vmem:[%s4789_s6 + $0x8] sm:$0xff]  ;;  %v781_v20 = vld [vmem:[%s4789_s6 + $0x10] sm:$0xff] }
 0x1cc   :  { %2352 = vmatmul.mubr.msk.f32.vlgmr.msra.gmra.mrb[8].mxu0 %vm932_vm9, %v779_v21  ;;  %v1286_v31 = vadd.f32 %v1270_v10, %v1231_v55  ;;  %v1290_v58 = vadd.f32 %v1274_v12, %v1235_v33  ;;  %v708_v25 = vadd.f32 %v5061_v52, %v3957_v2  ;;  %v709_v51 = vadd.f32 %v5063_v41, %v5062_v26  ;;  %v5066_v10 = vld [vmem:[#allocation89_spill] sm:$0xff]  ;;  %v5078_v5 = vld [vmem:[#allocation35_spill] sm:$0xff]  ;;  %v5082_v43 = vld [vmem:[#allocation32_spill] sm:$0xff] }
 0x1cd   :  { %v5064_v9 = vpack.c.bf16 %v3911_v37, %v3909_v34  ;;  %v5065_v11 = vmov 0.0   ;;  %v1287_v57 = vadd.f32 %v1271_v8, %v1232_v18  ;;  %v1291_v6 = vadd.f32 %v1275_v62, %v1236_v24  ;;  %2580 = vmatprep.subr.bf16.mxu1 %v2579_v17  ;;  %v5067_v55 = vld [vmem:[#allocation85_spill] sm:$0xff]  ;;  %v5088_v52 = vld [vmem:[#allocation20_spill] sm:$0xff] }
 0x1ce   :  { %1015 = vmatprep.mubr.f32.mxu0 %v5065_v11  ;;  %v657_v33 = vmul.f32 %v5010_v53, %v5066_v10  ;;  %v2597_v2 = vpack.c.bf16 %v1290_v58, %v1286_v31  ;;  %v4250_v12 = vadd.f32 %v3969_v16, %v708_v25  ;;  %v4253_v34 = vadd.f32 %v5067_v55, %v709_v51  ;;  %v5073_v16 = vld [vmem:[#allocation78_spill] sm:$0xff]  ;;  %v5081_v18 = vld [vmem:[#allocation33_spill] sm:$0xff]  ;;  %v5089_v25 = vld [vmem:[#allocation80_spill] sm:$0xff] }
 0x1cf   :  { %2586 = vmatpush1.bf16.msra.mxu0 %v5064_v9  ;;  %2582 = vmatpush1.bf16.msra.mxu1 %v2581_v49  ;;  %v2595_v37 = vpack.c.bf16 %v1291_v6, %v1287_v57  ;;  %v751_v35 = vmul.f32 %v5012_v47, %v5069_v13  ;;  %v658_v28 = vmul.f32 %v5071_v15, %v5070_v56  ;;  %v5085_v49 = vld [vmem:[#allocation19_spill] sm:$0xff]  ;;  %v5086_v8 = vld [vmem:[#allocation81_spill] sm:$0xff]  ;;  %v5090_v9 = vld [vmem:[#allocation66_spill] sm:$0xff] }
 0x1d0   :  { %2588 = vmatprep.subr.bf16.mxu0 %v2587_v60  ;;  %v712_v14 = vadd.f32 %v5068_v39, %v657_v33  ;;  %2353 = vmatmul.mubr.msk.f32.gmra.mrb[10].mxu0 %vm932_vm9, %v780_v46  ;;  %v5072_v63 = vpack.c.bf16 %v3965_v42, %v3946_v40  ;;  %v752_v4 = vmul.f32 %v5073_v16, %v3859_v36  ;;  %v5076_v40 = vld [vmem:[#allocation60_spill] sm:$0xff]  ;;  %v5079_v60 = vld [vmem:[#allocation18_spill] sm:$0xff]  ;;  %v5087_v31 = vld [vmem:[#allocation65_spill] sm:$0xff] }
 0x1d1   :  { %v661_v61 = vmul.f32 %v5010_v53, %v4043_v3  ;;  %v4270_v22 = vrot.slane %v5075_v0, %v5074_v27  ;;  %1021 = vmatprep.mubr.f32.mxu0 %v5065_v11  ;;  %v713_v42 = vadd.f32 %v5076_v40, %v658_v28  ;;  %v662_v36 = vmul.f32 %v5071_v15, %v3999_v50  ;;  %v5077_v3 = vld [vmem:[#allocation61_spill] sm:$0xff]  ;;  %v5093_v39 = vld [vmem:[#allocation38_spill] sm:$0xff] }
 0x1d2   :  { %2592 = vmatprep.subr.bf16.mxu1 %v5072_v63  ;;  %v4276_v59 = vadd.f32 %v751_v35, %v712_v14  ;;  %2356 = vmatmul.mubr.msk.f32.vlgmr.msra.gmra.mrb[8].mxu1 %vm932_vm9, %v779_v21  ;;  %v755_v45 = vmul.f32 %v5012_v47, %v5078_v5  ;;  %v756_v1 = vmul.f32 %v5073_v16, %v4020_v29  ;;  %v5084_v21 = vld [vmem:[#allocation62_spill] sm:$0xff]  ;;  %v782_v41 = vld [vmem:[%s4789_s6 + $0x18] sm:$0xff] }
 0x1d3   :  { %2590 = vmatpush1.bf16.msra.mxu0 %v2589_v32  ;;  %v716_v54 = vadd.f32 %v5077_v3, %v661_v61  ;;  %v5080_v32 = vld [vmem:[#allocation79_spill] sm:$0xff]  ;;  %v5083_v24 = vpack.c.bf16 %v5081_v18, %v5082_v43  ;;  %1104 = vmatprep.mubr.f32.mxu1 %v5065_v11  ;;  %v4293_v50 = vadd.f32 %v752_v4, %v713_v42  ;;  %v5091_v6 = vld [vmem:[#allocation21_spill] sm:$0xff]  ;;  %v5094_v13 = vld [vmem:[#allocation34_spill] sm:$0xff] }
 0x1d4   :  { %v655_v30 = vmul.f32 %v5080_v32, %v5079_v60  ;;  %v717_v17 = vadd.f32 %v5084_v21, %v662_v36  ;;  %v656_v62 = vmul.f32 %v5086_v8, %v5085_v49  ;;  %2354 = vmatmul.mubr.msk.f32.gmra.mrb[12].mxu0 %vm932_vm9, %v781_v20  ;;  %v749_v26 = vmul.f32 %v5089_v25, %v5088_v52  ;;  %v5092_v33 = vld [vmem:[#allocation37_spill] sm:$0xff]  ;;  %v5096_v4 = vld [vmem:[#allocation67_spill] sm:$0xff]  ;;  %v5098_v0 = vld [vmem:[#allocation70_spill] sm:$0xff] }
 0x1d5   :  { %2594 = vmatpush1.bf16.msra.mxu1 %v5083_v24  ;;  %v4299_v29 = vadd.f32 %v755_v45, %v716_v54  ;;  %1027 = vmatprep.mubr.f32.mxu0 %v5065_v11  ;;  %v750_v10 = vmul.f32 %v4270_v22, %v5091_v6  ;;  %v665_v55 = vmul.f32 %v5010_v53, %v5092_v33  ;;  %v5095_v56 = vld [vmem:[#allocation25_spill] sm:$0xff]  ;;  %v1139_v3 = vld [vmem:[%s4790_s5] sm:$0xff]  ;;  %v5103_v24 = vld [vmem:[#allocation72_spill] sm:$0xff] }
 0x1d6   :  { %2596 = vmatprep.subr.bf16.mxu1 %v2595_v37  ;;  %v710_v58 = vadd.f32 %v5087_v31, %v655_v30  ;;  %v4308_v51 = vadd.f32 %v756_v1, %v717_v17  ;;  %v711_v57 = vadd.f32 %v5090_v9, %v656_v62  ;;  %2357 = vmatmul.mubr.msk.f32.gmra.mrb[10].mxu1 %vm932_vm9, %v780_v46  ;;  %v5097_v61 = vld [vmem:[#allocation69_spill] sm:$0xff]  ;;  %v5102_v30 = vld [vmem:[#allocation71_spill] sm:$0xff]  ;;  %v5105_v49 = vld [vmem:[#allocation22_spill] sm:$0xff] }
 0x1d7   :  { %v759_v14 = vmul.f32 %v5012_v47, %v5093_v39  ;;  %v666_v35 = vmul.f32 %v5071_v15, %v5094_v13  ;;  %v659_v28 = vmul.f32 %v5080_v32, %v5095_v56  ;;  %1110 = vmatprep.mubr.f32.mxu1 %v5065_v11  ;;  %v720_v53 = vadd.f32 %v5096_v4, %v665_v55  ;;  %v5099_v15 = vld [vmem:[#allocation87_spill] sm:$0xff]  ;;  %v5100_v36 = vld [vmem:[#allocation29_spill] sm:$0xff] }
 0x1d8   :  { %v4316_v37 = vadd.f32 %v749_v26, %v710_v58  ;;  %v4325_v63 = vadd.f32 %v750_v10, %v711_v57  ;;  %v760_v46 = vmul.f32 %v5073_v16, %v3997_v44  ;;  %2355 = vmatmul.mubr.msk.f32.gmra.mrb[14].mxu0 %vm932_vm9, %v782_v41  ;;  %v753_v42 = vmul.f32 %v5089_v25, %v5099_v15  ;;  %v5101_v44 = vld [vmem:[#allocation88_spill] sm:$0xff]  ;;  %v5104_v17 = vld [vmem:[#allocation73_spill] sm:$0xff]  ;;  %v5107_v52 = vld [vmem:[#allocation7_spill] sm:$0xff] }
 0x1d9   :  { %2598 = vmatpush1.bf16.msra.mxu1 %v2597_v2  ;;  %v721_v47 = vadd.f32 %v5097_v61, %v666_v35  ;;  %v714_v40 = vadd.f32 %v5098_v0, %v659_v28  ;;  %v660_v2 = vmul.f32 %v5086_v8, %v5100_v36  ;;  %1368 = vmatprep.mubr.f32.mxu0 %v5065_v11  ;;  %v5106_v31 = vld [vmem:[#allocation53_spill] sm:$0xff]  ;;  %v1140_v9 = vld [vmem:[%s4790_s5 + $0x8] sm:$0xff]  ;;  %v5110_v10 = vld [vmem:[#allocation54_spill] sm:$0xff] }
 0x1da   :  { %v4341_v54 = vadd.f32 %v759_v14, %v720_v53  ;;  %v754_v16 = vmul.f32 %v4270_v22, %v5101_v44  ;;  %v663_v5 = vmul.f32 %v5080_v32, %v4171_v19  ;;  %v664_v45 = vmul.f32 %v5086_v8, %v4173_v7  ;;  %2358 = vmatmul.mubr.msk.f32.gmra.mrb[12].mxu1 %vm932_vm9, %v781_v20  ;;  %v2371_v13 = vld [vmem:[%s4788_s3 + $0x1] ss:$8 sm:$0xf] }
 0x1db   :  { %v4350_v1 = vadd.f32 %v760_v46, %v721_v47  ;;  %v4352_v60 = vadd.f32 %v753_v42, %v714_v40  ;;  %v715_v18 = vadd.f32 %v5102_v30, %v660_v2  ;;  %v757_v43 = vmul.f32 %v5089_v25, %v4185_v23  ;;  %1116 = vmatprep.mubr.f32.mxu1 %v5065_v11  ;;  %v5108_v23 = vld [vmem:[#allocation12_spill] sm:$0xff]  ;;  %v5112_v46 = vld [vmem:[#allocation3_spill] sm:$0xff] }
 0x1dc   :  { %v718_v21 = vadd.f32 %v5103_v24, %v663_v5  ;;  %v719_v19 = vadd.f32 %v5104_v17, %v664_v45  ;;  %v758_v7 = vmul.f32 %v4270_v22, %v4187_v48  ;;  %v667_v20 = vmul.f32 %v5080_v32, %v5105_v49  ;;  %2363 = vmatmul.mubr.msk.f32.vlgmr.msra.gmra.mrb[8].mxu0 %vm932_vm9, %v1139_v3  ;;  %v5109_v32 = vld [vmem:[#allocation74_spill] sm:$0xff]  ;;  %v5111_v28 = vld [vmem:[#allocation4_spill] sm:$0xff] }
 0x1dd   :  { %v770_v62 = vadd.f32 %v754_v16, %v715_v18  ;;  %v668_v58 = vmul.f32 %v5086_v8, %v5106_v31  ;;  %v707_v26 = vmul.f32 %v5108_v23, %v5107_v52  ;;  %1374 = vmatprep.mubr.f32.mxu0 %v5065_v11  ;;  %v761_v33 = vmul.f32 %v5089_v25, %v5110_v10  ;;  %v1141_v25 = vld [vmem:[%s4790_s5 + $0x10] sm:$0xff]  ;;  %v5113_v52 = vld [vmem:[#allocation5_spill] sm:$0xff] }
 0x1de   :  { %v4373_v57 = vadd.f32 %v757_v43, %v718_v21  ;;  %v4375_v48 = vadd.f32 %v758_v7, %v719_v19  ;;  %v722_v6 = vadd.f32 %v5109_v32, %v667_v20  ;;  %2359 = vmatmul.mubr.msk.f32.gmra.mrb[14].mxu1 %vm932_vm9, %v782_v41  ;;  %v762_v55 = vmul.f32 %v4270_v22, %v4141_v38  ;;  %v1142_v38 = vld [vmem:[%s4790_s5 + $0x18] sm:$0xff] }
 0x1df   :  { %v723_v8 = vadd.f32 %v707_v26, %v668_v58  ;;  %1457 = vmatprep.mubr.f32.mxu1 %v5065_v11  ;;  %v1508_v4 = vrot.slane %v2371_v13, %v5111_v28  ;;  %v1504_v61 = vrot.slane %v2371_v13, %v5112_v46  ;;  %v1516_v24 = vrot.slane %v2371_v13, %v5074_v27  ;;  %v1695_v28 = vld [vmem:[%s4792_s9 + $0x10] sm:$0xff] }
 0x1e0   :  { %v4384_v39 = vadd.f32 %v761_v33, %v722_v6  ;;  %2364 = vmatmul.mubr.msk.f32.gmra.mrb[10].mxu0 %vm932_vm9, %v1140_v9 }
 0x1e1   :  { %v4387_v14 = vadd.f32 %v762_v55, %v723_v8  ;;  %1380 = vmatprep.mubr.f32.mxu0 %v5065_v11  ;;  %v1537_v8 = vld [vmem:[%s4791_s7] sm:$0xff] }
 0x1e2   :  { %2367 = vmatmul.mubr.msk.f32.vlgmr.msra.gmra.mrb[8].mxu1 %vm932_vm9, %v1139_v3 }
 0x1e3   :  { %1463 = vmatprep.mubr.f32.mxu1 %v5065_v11 }
 0x1e4   :  { %2365 = vmatmul.mubr.msk.f32.gmra.mrb[12].mxu0 %vm932_vm9, %v1141_v25 }
 0x1e5   :  { %1386 = vmatprep.mubr.f32.mxu0 %v5065_v11 }
 0x1e6   :  { %2368 = vmatmul.mubr.msk.f32.gmra.mrb[10].mxu1 %vm932_vm9, %v1140_v9 }
 0x1e7   :  { %1469 = vmatprep.mubr.f32.mxu1 %v5065_v11 }
 0x1e8   :  { %2366 = vmatmul.mubr.msk.f32.gmra.mrb[14].mxu0 %vm932_vm9, %v1142_v38 }
 0x1e9   :  { %1605 = vmatprep.mubr.f32.mxu0 %v5065_v11 }
 0x1ea   :  { %2369 = vmatmul.mubr.msk.f32.gmra.mrb[12].mxu1 %vm932_vm9, %v1141_v25 }
 0x1eb   :  { %1475 = vmatprep.mubr.f32.mxu1 %v5065_v11 }
 0x1ee   :  { %2370 = vmatmul.mubr.msk.f32.gmra.mrb[14].mxu1 %vm932_vm9, %v1142_v38 }
 0x1ef   :  { %2489 = vmatprep.mubr.msk.f32.mxu1 %vm2740_vm10, %v5065_v11 }
 0x2af   :  { %v1370_v22 = vpop.f32.mrb[8].mxu0 }
 0x2b0   :  { %v2691_v41 = vadd.f32 %v1370_v22, %v4250_v12  ;;  %v1372_v35 = vpop.f32.mrb[9].mxu0 }
 0x2b1   :  { %v2692_v56 = vadd.f32 %v1372_v35, %v4253_v34  ;;  %v1693_v35 = vld [vmem:[%s4792_s9] sm:$0xff] }
 0x2b2   :  { %v4424_v16 = vadd.f32 %v2691_v41, %v1504_v61 }
 0x2b3   :  { %v1376_v53 = vpop.f32.mrb[10].mxu0  ;;  %v4419_v2 = vadd.f32 %v2692_v56, %v1508_v4  ;;  %v1694_v56 = vld [vmem:[%s4792_s9 + $0x8] sm:$0xff] }
 0x2b4   :  { %v2693_v47 = vadd.f32 %v1376_v53, %v4276_v59  ;;  %v1378_v0 = vpop.f32.mrb[11].mxu0  ;;  %v1696_v53 = vld [vmem:[%s4792_s9 + $0x18] sm:$0xff] }
 0x2b5   :  { %v2694_v40 = vadd.f32 %v1378_v0, %v4293_v50  ;;  %v1459_v15 = vpop.f32.mrb[8].mxu1  ;;  %v2619_v46 = vpack.c.bf16 %v1696_v53, %v1695_v28  ;;  %v2096_v28 = vld [vmem:[%s4793_s2 + $0x18] sm:$0xff]  ;;  %v2113_v53 = vld [vmem:[%s4793_s2 + $0xa0] sm:$0xff] }
 0x2b6   :  { %v4416_v42 = vadd.f32 %v2693_v47, %v1504_v61  ;;  %v2699_v12 = vadd.f32 %v1459_v15, %v4316_v37  ;;  %v1461_v36 = vpop.f32.mrb[9].mxu1 }
 0x2b7   :  { %v4421_v3 = vadd.f32 %v2694_v40, %v1508_v4  ;;  %v1382_v34 = vpop.f32.mrb[12].mxu0  ;;  %v2700_v44 = vadd.f32 %v1461_v36, %v4325_v63  ;;  %v1698_v36 = vld [vmem:[%s4792_s9 + $0x28] sm:$0xff] }
 0x2b8   :  { %v2695_v59 = vadd.f32 %v1382_v34, %v4299_v29  ;;  %v1384_v5 = vpop.f32.mrb[13].mxu0  ;;  %v2601_v37 = vpack.c.bf16 %v4416_v42, %v4424_v16 }
 0x2b9   :  { %v2696_v50 = vadd.f32 %v1384_v5, %v4308_v51  ;;  %v2599_v45 = vpack.c.bf16 %v4421_v3, %v4419_v2  ;;  %v1465_v30 = vpop.f32.mrb[10].mxu1  ;;  %v4443_v27 = vadd.f32 %v2700_v44, %v1516_v24  ;;  %v1699_v5 = vld [vmem:[%s4792_s9 + $0x30] sm:$0xff] }
 0x2ba   :  { %v2701_v18 = vadd.f32 %v1465_v30, %v4352_v60  ;;  %v1467_v43 = vpop.f32.mrb[11].mxu1  ;;  %v2374_v30 = vld [vmem:[%s4792_s9 + $0x40] ss:$0 sm:$0xff] }
 0x2bb   :  { %v1388_v63 = vpop.f32.mrb[14].mxu0  ;;  %2600 = vmatprep.subr.bf16.mxu0 %v2599_v45  ;;  %v2702_v21 = vadd.f32 %v1467_v43, %v770_v62  ;;  %v4441_v31 = vadd.f32 %v2696_v50, %v1508_v4  ;;  %v4448_v62 = vadd.f32 %v2695_v59, %v1504_v61  ;;  %v1700_v50 = vld [vmem:[%s4792_s9 + $0x38] sm:$0xff] }
 0x2bc   :  { %v2697_v29 = vadd.f32 %v1388_v63, %v4341_v54  ;;  %v1390_v17 = vpop.f32.mrb[15].mxu0  ;;  %2602 = vmatpush1.bf16.msra.mxu0 %v2601_v37  ;;  %v2625_v45 = vpack.c.bf16 %v1700_v50, %v1699_v5  ;;  %v2376_v63 = vld [vmem:[%s4792_s9 + $0x41] ss:$0 sm:$0xff]  ;;  %v2118_v5 = vld [vmem:[%s4793_s2 + $0xc8] sm:$0xff] }
 0x2bd   :  { %v2698_v51 = vadd.f32 %v1390_v17, %v4350_v1  ;;  %v4436_v19 = vadd.f32 %v2702_v21, %v1516_v24  ;;  %v1471_v7 = vpop.f32.mrb[12].mxu1  ;;  %v1512_v1 = vrot.slane %v2371_v13, %v5113_v52  ;;  %v2738_v13 = vmov 0.0|0.0  }
 0x2be   :  { %v4438_v49 = vadd.f32 %v2697_v29, %v1504_v61  ;;  %v2703_v20 = vadd.f32 %v1471_v7, %v4373_v57  ;;  %v1473_v60 = vpop.f32.mrb[13].mxu1  ;;  %2615 = vmatprep.subr.bf16.mxu1 %v2738_v13 }
 0x2bf   :  { %v4445_v58 = vadd.f32 %v2698_v51, %v1508_v4  ;;  %v2704_v54 = vadd.f32 %v1473_v60, %v4375_v48  ;;  %v2607_v9 = vpack.c.bf16 %v4436_v19, %v4443_v27  ;;  %v4457_v32 = vadd.f32 %v2701_v18, %v1512_v1 }
 0x2c0   :  { %v2605_v57 = vpack.c.bf16 %v4438_v49, %v4448_v62  ;;  %v4461_v33 = vadd.f32 %v2699_v12, %v1512_v1  ;;  %v4477_v22 = vadd.f32 %v2703_v20, %v1512_v1  ;;  %v2616_v4 = vpack.c.bf16 %v1694_v56, %v1693_v35  ;;  %v1697_v12 = vld [vmem:[%s4792_s9 + $0x20] sm:$0xff]  ;;  %v2095_v56 = vld [vmem:[%s4793_s2 + $0x10] sm:$0xff] }
 0x2c1   :  { %v2603_v23 = vpack.c.bf16 %v4445_v58, %v4441_v31  ;;  %v1477_v26 = vpop.f32.mrb[14].mxu1  ;;  %v4466_v55 = vadd.f32 %v2704_v54, %v1516_v24  ;;  %v2622_v44 = vpack.c.bf16 %v1698_v36, %v1697_v12  ;;  %v2116_v12 = vld [vmem:[%s4793_s2 + $0xb8] sm:$0xff] }
 0x2c2   :  { %v2705_v6 = vadd.f32 %v1477_v26, %v4384_v39  ;;  %v1479_v10 = vpop.f32.mrb[15].mxu1  ;;  %v2609_v38 = vpack.c.bf16 %v4457_v32, %v4461_v33  ;;  %2617 = vmatpush3.bf16.msra.mxu1 %v2616_v4  ;;  %v2633_v4 = vpack.c.bf16 %v2096_v28, %v2095_v56  ;;  %v2146_v56 = vld [vmem:[%s4793_s2 + $0x1a8] sm:$0xff] }
 0x2c3   :  { %2604 = vmatprep.subr.bf16.mxu0 %v2603_v23  ;;  %v2706_v48 = vadd.f32 %v1479_v10, %v4387_v14  ;;  %2618 = vmatprep.subr.bf16.mxu1 %v2738_v13  ;;  %v5114_v23 = vld [vmem:[#allocation2_spill] sm:$0xff]  ;;  %v2110_v10 = vld [vmem:[%s4793_s2 + $0x88] sm:$0xff] }
 0x2c4   :  { %2606 = vmatpush1.bf16.msra.mxu0 %v2605_v57  ;;  %v4472_v39 = vadd.f32 %v2705_v6, %v1512_v1  ;;  %v2109_v6 = vld [vmem:[%s4793_s2 + $0x80] sm:$0xff]  ;;  %v1892_v28 = vld [vmem:[%s4794_s8 + $0x8] sm:$0xff] }
 0x2c5   :  { %v4468_v25 = vadd.f32 %v2706_v48, %v1516_v24  ;;  %2608 = vmatprep.subr.bf16.mxu0 %v2607_v9  ;;  %v2627_v48 = vpack.c.bf16 %v2110_v10, %v2109_v6 }
 0x2c6   :  { %v2613_v41 = vpack.c.bf16 %v4472_v39, %v4477_v22  ;;  %2620 = vmatpush3.bf16.msra.mxu1 %v2619_v46  ;;  %v2114_v46 = vld [vmem:[%s4793_s2 + $0xa8] sm:$0xff] }
 0x2c7   :  { %2372 = vmatmul.mubr.msk.f32.vlgmr.msra.gmra.mrb[16].mxu0 %vm932_vm9, %v1537_v8  ;;  %v2611_v14 = vpack.c.bf16 %v4468_v25, %v4466_v55  ;;  %2621 = vmatprep.subr.bf16.mxu1 %v2738_v13 }
 0x2c8   :  { %2610 = vmatpush1.bf16.msra.mxu0 %v2609_v38  ;;  %1676 = vmatprep.mubr.f32.mxu0 %v5065_v11  ;;  %v2094_v38 = vld [vmem:[%s4793_s2 + $0x8] sm:$0xff] }
 0x2c9   :  { %2612 = vmatprep.subr.bf16.mxu0 %v2611_v14 }
 0x2cc   :  { %2614 = vmatpush1.bf16.msra.mxu0 %v2613_v41  ;;  %v2111_v41 = vld [vmem:[%s4793_s2 + $0x90] sm:$0xff] }
 0x2cf   :  { %2373 = vmatmul.mubr.msk.f32.vlgmr.msra.gmra.mrb[16].mxu0 %vm932_vm9, %v1537_v8  ;;  %v2093_v8 = vld [vmem:[%s4793_s2] sm:$0xff] }
 0x2d0   :  { %1972 = vmatprep.mubr.f32.mxu0 %v5065_v11  ;;  %v2629_v14 = vpack.c.bf16 %v2094_v38, %v2093_v8  ;;  %v1891_v8 = vld [vmem:[%s4794_s8] sm:$0xff] }
 0x3a2   :  { %v1678_v61 = vpop.f32.mrb[16].mxu0 }
 0x3a3   :  { %v1680_v47 = vpop.f32.mrb[17].mxu0 }
 0x3a4   :  { %v1685_v0 = vadd.f32 %v1680_v47, %v1678_v61  ;;  %v2635_v61 = vpack.c.bf16 %v2114_v46, %v2113_v53  ;;  %v2097_v47 = vld [vmem:[%s4793_s2 + $0x20] sm:$0xff] }
 0x3a5   :  { %v2129_v46 = vld [vmem:[%s4793_s2 + $0x120] sm:$0xff] }
 0x3a6   :  { %1686 = vrot.lane.b32.xlu0 %v1685_v0, %s2739_s25 }
 0x418   :  { %v1687_v40 = vpop.permute.xlu0 %1686 }
 0x419   :  { %v1689_v15 = vadd.f32 %v1687_v40, %v1685_v0  ;;  %v2098_v0 = vld [vmem:[%s4793_s2 + $0x28] sm:$0xff] }
 0x41a   :  { %v2637_v40 = vpack.c.bf16 %v2098_v0, %v2097_v47  ;;  %v2147_v47 = vld [vmem:[%s4793_s2 + $0x1b0] sm:$0xff]  ;;  %v2148_v0 = vld [vmem:[%s4793_s2 + $0x1b8] sm:$0xff] }
 0x41b   :  { %1690 = vrot.lane.b32.xlu1 %v1689_v15, %s2736_s17 }
 0x41f   :  { %1865 = vrot.lane.b32.xlu1 %v5065_v11, %s2736_s17 }
 0x48d   :  { %v1691_v34 = vpop.permute.xlu1 %1690 }
 0x48e   :  { %v1692_v59 = vadd.f32 %v1691_v34, %v1689_v15  ;;  %v2115_v15 = vld [vmem:[%s4793_s2 + $0xb0] sm:$0xff] }
 0x48f   :  { %v2639_v36 = vpack.c.bf16 %v2116_v12, %v2115_v15  ;;  %v2099_v34 = vld [vmem:[%s4793_s2 + $0x30] sm:$0xff]  ;;  %v2671_v12 = vpack.c.bf16 %v2148_v0, %v2147_v47  ;;  %v2108_v0 = vld [vmem:[%s4793_s2 + $0x78] sm:$0xff] }
 0x490   :  { %2490 = vmatmul.mubr.msk.f32.vlgmr.msra.gmra.mrb[16].mxu1 %vm932_vm9, %v1692_v59  ;;  %v2117_v59 = vld [vmem:[%s4793_s2 + $0xc0] sm:$0xff]  ;;  %v2107_v47 = vld [vmem:[%s4793_s2 + $0x70] sm:$0xff] }
 0x491   :  { %2623 = vmatpush3.bf16.msra.mxu1 %v2622_v44  ;;  %2500 = vmatprep.mubr.msk.f32.mxu1 %vm2740_vm10, %v5065_v11  ;;  %v1866_v52 = vpop.permute.xlu1 %1865  ;;  %v2100_v44 = vld [vmem:[%s4793_s2 + $0x38] sm:$0xff] }
 0x492   :  { %2624 = vmatprep.subr.bf16.mxu1 %v2738_v13  ;;  %v2112_v13 = vld [vmem:[%s4793_s2 + $0x98] sm:$0xff]  ;;  %v2641_v50 = vpack.c.bf16 %v2100_v44, %v2099_v34  ;;  %v2149_v44 = vld [vmem:[%s4793_s2 + $0x1c0] sm:$0xff] }
 0x493   :  { %v2631_v35 = vpack.c.bf16 %v2112_v13, %v2111_v41  ;;  %v2127_v41 = vld [vmem:[%s4793_s2 + $0x110] sm:$0xff]  ;;  %v2128_v13 = vld [vmem:[%s4793_s2 + $0x118] sm:$0xff] }
 0x494   :  { %v2132_v34 = vld [vmem:[%s4793_s2 + $0x138] sm:$0xff] }
 0x495   :  { %2626 = vmatpush3.bf16.msra.mxu1 %v2625_v45  ;;  %v2643_v45 = vpack.c.bf16 %v2118_v5, %v2117_v59  ;;  %v2150_v59 = vld [vmem:[%s4793_s2 + $0x1c8] sm:$0xff]  ;;  %v1894_v5 = vld [vmem:[%s4794_s8 + $0x18] sm:$0xff] }
 0x496   :  { %2628 = vmatprep.subr.bf16.mxu1 %v2627_v48 }
 0x563   :  { %v1776_v37 = vpop.f32.mrb[16].mxu1 }
 0x564   :  { %v1777_v18 = vadd.f32 %v2374_v30, %v1776_v37  ;;  %v2491_v43 = vpop.f32.mrb[17].mxu1 }
 0x566   :  { %v1780_v24 = vmax.f32 %v1777_v18, 0.0 }
 0x568   :  { %2501 = vmatmul.mubr.msk.f32.vlgmr.msra.gmra.mrb[18].mxu1 %vm932_vm9, %v1780_v24 }
 0x569   :  { %2630 = vmatpush3.bf16.msra.mxu1 %v2629_v14 }
 0x56a   :  { %2632 = vmatprep.subr.bf16.mxu1 %v2631_v35  ;;  %v2145_v35 = vld [vmem:[%s4793_s2 + $0x1a0] sm:$0xff] }
 0x56b   :  { %v2667_v53 = vpack.c.bf16 %v2146_v56, %v2145_v35  ;;  %v2123_v35 = vld [vmem:[%s4793_s2 + $0xf0] sm:$0xff]  ;;  %v2124_v56 = vld [vmem:[%s4793_s2 + $0xf8] sm:$0xff] }
 0x56d   :  { %2634 = vmatpush3.bf16.msra.mxu1 %v2633_v4  ;;  %v2665_v4 = vpack.c.bf16 %v2128_v13, %v2127_v41  ;;  %v2138_v13 = vld [vmem:[%s4793_s2 + $0x168] sm:$0xff] }
 0x56e   :  { %2636 = vmatprep.subr.bf16.mxu1 %v2635_v61  ;;  %v2130_v61 = vld [vmem:[%s4793_s2 + $0x128] sm:$0xff] }
 0x56f   :  { %v2669_v15 = vpack.c.bf16 %v2130_v61, %v2129_v46  ;;  %v2156_v46 = vld [vmem:[%s4793_s2 + $0x1f8] sm:$0xff] }
 0x571   :  { %2638 = vmatpush3.bf16.msra.mxu1 %v2637_v40  ;;  %v1893_v40 = vld [vmem:[%s4794_s8 + $0x10] sm:$0xff] }
 0x572   :  { %2640 = vmatprep.subr.bf16.mxu1 %v2639_v36  ;;  %v2131_v36 = vld [vmem:[%s4793_s2 + $0x130] sm:$0xff] }
 0x575   :  { %2642 = vmatpush3.bf16.msra.mxu1 %v2641_v50  ;;  %v2673_v50 = vpack.c.bf16 %v2132_v34, %v2131_v36 }
 0x576   :  { %2644 = vmatprep.subr.bf16.mxu1 %v2643_v45  ;;  %v2675_v45 = vpack.c.bf16 %v2150_v59, %v2149_v44 }
 0x63b   :  { %v1854_v21 = vpop.f32.mrb[18].mxu1 }
 0x63c   :  { %v1855_v29 = vadd.f32 %v2376_v63, %v1854_v21  ;;  %v2502_v17 = vpop.f32.mrb[19].mxu1 }
 0x63e   :  { %v1858_v51 = vadd.f32 3.0, %v1855_v29 }
 0x640   :  { %v1859_v7 = vmax.f32 %v1858_v51, 0.0 }
 0x642   :  { %v1860_v20 = vmin.f32 %v1859_v7, 6.0  ;;  %v2141_v7 = vld [vmem:[%s4793_s2 + $0x180] sm:$0xff] }
 0x644   :  { %v1861_v60 = vmul.f32 0.16666667, %v1860_v20  ;;  %v2142_v20 = vld [vmem:[%s4793_s2 + $0x188] sm:$0xff] }
 0x645   :  { %v2659_v48 = vpack.c.bf16 %v2142_v20, %v2141_v7  ;;  %v2103_v20 = vld [vmem:[%s4793_s2 + $0x50] sm:$0xff] }
 0x646   :  { %v1862_v54 = vsel %vm932_vm9, %v1861_v60, 0.0 }
 0x647   :  { %1863 = vrot.lane.b32.xlu0 %v1862_v54, %s2736_s17 }
 0x6b9   :  { %v1864_v1 = vpop.permute.xlu0 %1863 }
 0x6ba   :  { %v1867_v26 = vsel %vm420_vm0, %v1864_v1, %v1866_v52  ;;  %v1868_v9 = vsel %vm420_vm0, %v1866_v52, %v1864_v1  ;;  %vm1688_vm0 = vcmp.lt.s32.totalorder %v5114_v23, 64 }
 0x6bb   :  { %1874 = vrot.lane.b32.xlu1 %v1867_v26, %s2739_s25  ;;  %v1869_v57 = vadd.f32 %v1868_v9, %v1862_v54  ;;  %v2125_v9 = vld [vmem:[%s4793_s2 + $0x100] sm:$0xff] }
 0x6bd   :  { %1872 = vrot.lane.b32.xlu0 %v1869_v57, %s2739_s25 }
 0x6c1   :  { %1876 = vrot.lane.b32.xlu0 %v1866_v52, %s2739_s25 }
 0x72d   :  { %v1875_v37 = vpop.permute.xlu1 %1874 }
 0x72f   :  { %v1873_v30 = vpop.permute.xlu0 %1872 }
 0x730   :  { %v1879_v18 = vsel %vm1688_vm0, %v1873_v30, %v1875_v37 }
 0x731   :  { %v1882_v29 = vadd.f32 %v1879_v18, %v1867_v26  ;;  %v2143_v26 = vld [vmem:[%s4793_s2 + $0x190] sm:$0xff] }
 0x733   :  { %v1877_v43 = vpop.permute.xlu0 %1876 }
 0x734   :  { %v1878_v24 = vsel %vm1688_vm0, %v1875_v37, %v1877_v43  ;;  %v1880_v63 = vsel %vm1688_vm0, %v1877_v43, %v1873_v30  ;;  %v1884_v21 = vadd.f32 %v1877_v43, %v1866_v52  ;;  %v2101_v30 = vld [vmem:[%s4793_s2 + $0x40] sm:$0xff]  ;;  %v2134_v43 = vld [vmem:[%s4793_s2 + $0x148] sm:$0xff] }
 0x735   :  { %v1881_v17 = vadd.f32 %v1880_v63, %v1869_v57  ;;  %v1883_v51 = vadd.f32 %v1878_v24, %v1866_v52  ;;  %v2126_v52 = vld [vmem:[%s4793_s2 + $0x108] sm:$0xff]  ;;  %v2144_v57 = vld [vmem:[%s4793_s2 + $0x198] sm:$0xff]  ;;  %v2133_v37 = vld [vmem:[%s4793_s2 + $0x140] sm:$0xff] }
 0x736   :  { %v2661_v38 = vpack.c.bf16 %v2126_v52, %v2125_v9  ;;  %v2663_v14 = vpack.c.bf16 %v2144_v57, %v2143_v26  ;;  %v2119_v24 = vld [vmem:[%s4793_s2 + $0xd0] sm:$0xff]  ;;  %v2120_v63 = vld [vmem:[%s4793_s2 + $0xd8] sm:$0xff]  ;;  %v2121_v9 = vld [vmem:[%s4793_s2 + $0xe0] sm:$0xff] }
 0x737   :  { %v1885_v60 = vadd.f32 %v1884_v21, %v1881_v17  ;;  %v1886_v54 = vadd.f32 %v1882_v29, %v1881_v17  ;;  %v1887_v1 = vadd.f32 %v1883_v51, %v1882_v29  ;;  %v1888_v23 = vadd.f32 %v1884_v21, %v1883_v51  ;;  %v2151_v17 = vld [vmem:[%s4793_s2 + $0x1d0] sm:$0xff]  ;;  %v2152_v51 = vld [vmem:[%s4793_s2 + $0x1d8] sm:$0xff]  ;;  %v2122_v52 = vld [vmem:[%s4793_s2 + $0xe8] sm:$0xff] }
 0x738   :  { %v2677_v21 = vpack.c.bf16 %v2134_v43, %v2133_v37  ;;  %v2647_v29 = vpack.c.bf16 %v2120_v63, %v2119_v24  ;;  %v2679_v7 = vpack.c.bf16 %v2152_v51, %v2151_v17  ;;  %v2651_v57 = vpack.c.bf16 %v2122_v52, %v2121_v9 }
 0x739   :  { %v1889_v6 = vadd.f32 %v1887_v1, %v1885_v60  ;;  %v1890_v10 = vadd.f32 %v1888_v23, %v1886_v54  ;;  %v2104_v60 = vld [vmem:[%s4793_s2 + $0x58] sm:$0xff]  ;;  %v2135_v54 = vld [vmem:[%s4793_s2 + $0x150] sm:$0xff] }
 0x73a   :  { %v2649_v1 = vpack.c.bf16 %v2104_v60, %v2103_v20  ;;  %v2136_v23 = vld [vmem:[%s4793_s2 + $0x158] sm:$0xff] }
 0x73b   :  { %1908 = vmatprep.subr.mxu0 %v1890_v10  ;;  %v2681_v26 = vpack.c.bf16 %v2136_v23, %v2135_v54  ;;  %v2154_v10 = vld [vmem:[%s4793_s2 + $0x1e8] sm:$0xff] }
 0x73c   :  { %1909 = vmatpush1.msra.mxu0 %v1889_v6  ;;  %v2153_v6 = vld [vmem:[%s4793_s2 + $0x1e0] sm:$0xff] }
 0x73d   :  { %2378 = vmatmul.mubr.msk.f32.vlgmr.msra.gmra.mrb[18].mxu0 %vm1895_vm11, %v1891_v8  ;;  %2660 = vmatprep.subr.bf16.mxu0 %v2659_v48  ;;  %v2683_v48 = vpack.c.bf16 %v2154_v10, %v2153_v6  ;;  %v2105_v8 = vld [vmem:[%s4793_s2 + $0x60] sm:$0xff] }
 0x73e   :  { %1978 = vmatprep.mubr.f32.mxu0 %v5065_v11  ;;  %2662 = vmatpush3.bf16.msra.mxu0 %v2661_v38  ;;  %v2106_v38 = vld [vmem:[%s4793_s2 + $0x68] sm:$0xff] }
 0x73f   :  { %2664 = vmatprep.subr.bf16.mxu0 %v2663_v14  ;;  %v2137_v14 = vld [vmem:[%s4793_s2 + $0x160] sm:$0xff]  ;;  %v2653_v41 = vpack.c.bf16 %v2106_v38, %v2105_v8 }
 0x741   :  { %2379 = vmatmul.mubr.msk.f32.gmra.mrb[20].mxu0 %vm1895_vm11, %v1892_v28  ;;  %v2685_v28 = vpack.c.bf16 %v2138_v13, %v2137_v14 }
 0x742   :  { %1984 = vmatprep.mubr.f32.mxu0 %v5065_v11  ;;  %2666 = vmatpush3.bf16.msra.mxu0 %v2665_v4  ;;  %v2655_v4 = vpack.c.bf16 %v2124_v56, %v2123_v35 }
 0x743   :  { %2668 = vmatprep.subr.bf16.mxu0 %v2667_v53  ;;  %v2155_v53 = vld [vmem:[%s4793_s2 + $0x1f0] sm:$0xff] }
 0x744   :  { %v2687_v61 = vpack.c.bf16 %v2156_v46, %v2155_v53 }
 0x745   :  { %2380 = vmatmul.mubr.msk.f32.gmra.mrb[22].mxu0 %vm1895_vm11, %v1893_v40  ;;  %v2139_v40 = vld [vmem:[%s4793_s2 + $0x170] sm:$0xff] }
 0x746   :  { %1990 = vmatprep.mubr.f32.mxu0 %v5065_v11  ;;  %2670 = vmatpush3.bf16.msra.mxu0 %v2669_v15  ;;  %v2102_v11 = vld [vmem:[%s4793_s2 + $0x48] sm:$0xff]  ;;  %v2657_v15 = vpack.c.bf16 %v2108_v0, %v2107_v47 }
 0x747   :  { %2672 = vmatprep.subr.bf16.mxu0 %v2671_v12  ;;  %v2645_v18 = vpack.c.bf16 %v2102_v11, %v2101_v30  ;;  %v2140_v12 = vld [vmem:[%s4793_s2 + $0x178] sm:$0xff] }
 0x748   :  { %v2689_v36 = vpack.c.bf16 %v2140_v12, %v2139_v40 }
 0x749   :  { %2381 = vmatmul.mubr.msk.f32.gmra.mrb[24].mxu0 %vm1895_vm11, %v1894_v5  ;;  %2646 = vmatpush3.bf16.msra.mxu1 %v2645_v18 }
 0x74a   :  { %2674 = vmatpush3.bf16.msra.mxu0 %v2673_v50  ;;  %2648 = vmatprep.subr.bf16.mxu1 %v2647_v29 }
 0x74b   :  { %2676 = vmatprep.subr.bf16.mxu0 %v2675_v45 }
 0x74d   :  { %2650 = vmatpush3.bf16.msra.mxu1 %v2649_v1 }
 0x74e   :  { %2678 = vmatpush3.bf16.msra.mxu0 %v2677_v21  ;;  %2652 = vmatprep.subr.bf16.mxu1 %v2651_v57 }
 0x74f   :  { %2680 = vmatprep.subr.bf16.mxu0 %v2679_v7 }
 0x751   :  { %2654 = vmatpush3.bf16.msra.mxu1 %v2653_v41 }
 0x752   :  { %2682 = vmatpush3.bf16.msra.mxu0 %v2681_v26  ;;  %2656 = vmatprep.subr.bf16.mxu1 %v2655_v4 }
 0x753   :  { %2684 = vmatprep.subr.bf16.mxu0 %v2683_v48 }
 0x755   :  { %2658 = vmatpush3.bf16.msra.mxu1 %v2657_v15 }
 0x756   :  { %2686 = vmatpush3.bf16.msra.mxu0 %v2685_v28 }
 0x757   :  { %2688 = vmatprep.subr.bf16.mxu0 %v2687_v61 }
 0x75a   :  { %2690 = vmatpush3.bf16.msra.mxu0 %v2689_v36 }
 0x810   :  { %v1974_v34 = vpop.f32.mrb[18].mxu0 }
 0x811   :  { %v1997_v44 = vmul.f32 %v1974_v34, %v4424_v16  ;;  %v1999_v59 = vmul.f32 %v1974_v34, %v4461_v33  ;;  %v1976_v5 = vpop.f32.mrb[19].mxu0 }
 0x812   :  { %v1998_v50 = vmul.f32 %v1976_v5, %v4419_v2  ;;  %v2000_v45 = vmul.f32 %v1976_v5, %v4443_v27 }
 0x813   :  { %v2013_v30 = vadd.f32 3.0, %v1997_v44  ;;  %v2015_v11 = vadd.f32 3.0, %v1999_v59 }
 0x814   :  { %v2014_v37 = vadd.f32 3.0, %v1998_v50  ;;  %v2016_v18 = vadd.f32 3.0, %v2000_v45  ;;  %v1980_v43 = vpop.f32.mrb[20].mxu0 }
 0x815   :  { %v2029_v24 = vmax.f32 %v2013_v30, 0.0  ;;  %v2031_v63 = vmax.f32 %v2015_v11, 0.0  ;;  %v2001_v21 = vmul.f32 %v1980_v43, %v4416_v42  ;;  %v2003_v29 = vmul.f32 %v1980_v43, %v4457_v32  ;;  %v1982_v17 = vpop.f32.mrb[21].mxu0 }
 0x816   :  { %v2030_v16 = vmax.f32 %v2014_v37, 0.0  ;;  %v2032_v51 = vmax.f32 %v2016_v18, 0.0  ;;  %v2002_v33 = vmul.f32 %v1982_v17, %v4421_v3  ;;  %v2004_v2 = vmul.f32 %v1982_v17, %v4436_v19 }
 0x817   :  { %v2045_v7 = vmin.f32 %v2029_v24, 6.0  ;;  %v2047_v27 = vmin.f32 %v2031_v63, 6.0  ;;  %v2017_v20 = vadd.f32 3.0, %v2001_v21  ;;  %v2019_v60 = vadd.f32 3.0, %v2003_v29 }
 0x818   :  { %v2046_v54 = vmin.f32 %v2030_v16, 6.0  ;;  %v2048_v1 = vmin.f32 %v2032_v51, 6.0  ;;  %v2018_v23 = vadd.f32 3.0, %v2002_v33  ;;  %v2020_v9 = vadd.f32 3.0, %v2004_v2  ;;  %v1986_v52 = vpop.f32.mrb[22].mxu0 }
 0x819   :  { %v2061_v26 = vmul.f32 0.16666667, %v2045_v7  ;;  %v2063_v42 = vmul.f32 0.16666667, %v2047_v27  ;;  %v2033_v57 = vmax.f32 %v2017_v20, 0.0  ;;  %v2035_v32 = vmax.f32 %v2019_v60, 0.0 }
 0x81a   :  { %v2062_v6 = vmul.f32 0.16666667, %v2046_v54  ;;  %v2064_v10 = vmul.f32 0.16666667, %v2048_v1  ;;  %v2034_v48 = vmax.f32 %v2018_v23, 0.0  ;;  %v2036_v8 = vmax.f32 %v2020_v9, 0.0 }
 0x81b   :  { %v2077_v3 = vmul.f32 %v2061_v26, %v1997_v44  ;;  %v2079_v38 = vmul.f32 %v2063_v42, %v1999_v59  ;;  %v2049_v19 = vmin.f32 %v2033_v57, 6.0  ;;  %v2051_v14 = vmin.f32 %v2035_v32, 6.0  ;;  %v1988_v41 = vpop.f32.mrb[23].mxu0 }
 0x81c   :  { %v2078_v13 = vmul.f32 %v2062_v6, %v1998_v50  ;;  %v2080_v35 = vmul.f32 %v2064_v10, %v2000_v45  ;;  %v2050_v56 = vmin.f32 %v2034_v48, 6.0  ;;  %v2052_v28 = vmin.f32 %v2036_v8, 6.0  ;;  %v1992_v4 = vpop.f32.mrb[24].mxu0 }
 0x81d   :  { %v2065_v53 = vmul.f32 0.16666667, %v2049_v19  ;;  %v2067_v46 = vmul.f32 0.16666667, %v2051_v14  ;;  %v2005_v61 = vmul.f32 %v1986_v52, %v4448_v62  ;;  %v2007_v47 = vmul.f32 %v1986_v52, %v4477_v22  ;;  %v1994_v0 = vpop.f32.mrb[25].mxu0 }
 0x81e   :  { %v2066_v40 = vmul.f32 0.16666667, %v2050_v56  ;;  %v2068_v15 = vmul.f32 0.16666667, %v2052_v28  ;;  %v2006_v12 = vmul.f32 %v1988_v41, %v4441_v31  ;;  %v2008_v36 = vmul.f32 %v1988_v41, %v4466_v55  ;;  %2228 = vmatprep.mubr.f32.mxu1 %v2078_v13  ;;  %2313 = vmatprep.mubr.f32.mxu0 %v2080_v35  ;;  %v2382_v13 = vld [vmem:[%s4795_s4] ss:$0 sm:$0xff] }
 0x81f   :  { %v2081_v34 = vmul.f32 %v2065_v53, %v2001_v21  ;;  %v2083_v44 = vmul.f32 %v2067_v46, %v2003_v29  ;;  %v2021_v59 = vadd.f32 3.0, %v2005_v61  ;;  %v2023_v5 = vadd.f32 3.0, %v2007_v47  ;;  %2229 = vmatmul.mubr.f32.vlgmr.msra.gmra.mrb[20].mxu1 %v2077_v3  ;;  %2314 = vmatmul.mubr.f32.vlgmr.msra.gmra.mrb[26].mxu0 %v2079_v38 }
 0x820   :  { %v2082_v50 = vmul.f32 %v2066_v40, %v2002_v33  ;;  %v2084_v45 = vmul.f32 %v2068_v15, %v2004_v2  ;;  %v2022_v62 = vadd.f32 3.0, %v2006_v12  ;;  %v2024_v30 = vadd.f32 3.0, %v2008_v36 }
 0x821   :  { %v2037_v22 = vmax.f32 %v2021_v59, 0.0  ;;  %v2039_v11 = vmax.f32 %v2023_v5, 0.0  ;;  %v2009_v37 = vmul.f32 %v1992_v4, %v4438_v49  ;;  %v2011_v31 = vmul.f32 %v1992_v4, %v4472_v39  ;;  %v2732_v5 = vld [vmem:[%s4787_s0 + $0x8] sm:$0xff] }
 0x822   :  { %v2038_v18 = vmax.f32 %v2022_v62, 0.0  ;;  %v2040_v55 = vmax.f32 %v2024_v30, 0.0  ;;  %v2010_v43 = vmul.f32 %v1994_v0, %v4445_v58  ;;  %v2012_v24 = vmul.f32 %v1994_v0, %v4468_v25  ;;  %2233 = vmatprep.mubr.f32.mxu1 %v2082_v50  ;;  %2318 = vmatprep.mubr.f32.mxu0 %v2084_v45 }
 0x823   :  { %v2053_v63 = vmin.f32 %v2037_v22, 6.0  ;;  %v2055_v21 = vmin.f32 %v2039_v11, 6.0  ;;  %v2025_v29 = vadd.f32 3.0, %v2009_v37  ;;  %v2027_v17 = vadd.f32 3.0, %v2011_v31  ;;  %2234 = vmatmul.mubr.f32.gmra.mrb[22].mxu1 %v2081_v34  ;;  %2319 = vmatmul.mubr.f32.gmra.mrb[28].mxu0 %v2083_v44 }
 0x824   :  { %v2054_v16 = vmin.f32 %v2038_v18, 6.0  ;;  %v2056_v51 = vmin.f32 %v2040_v55, 6.0  ;;  %v2026_v33 = vadd.f32 3.0, %v2010_v43  ;;  %v2028_v49 = vadd.f32 3.0, %v2012_v24 }
 0x825   :  { %v2069_v2 = vmul.f32 0.16666667, %v2053_v63  ;;  %v2071_v39 = vmul.f32 0.16666667, %v2055_v21  ;;  %v2041_v7 = vmax.f32 %v2025_v29, 0.0  ;;  %v2043_v27 = vmax.f32 %v2027_v17, 0.0 }
 0x826   :  { %v2070_v20 = vmul.f32 0.16666667, %v2054_v16  ;;  %v2072_v58 = vmul.f32 0.16666667, %v2056_v51  ;;  %v2042_v60 = vmax.f32 %v2026_v33, 0.0  ;;  %v2044_v25 = vmax.f32 %v2028_v49, 0.0 }
 0x827   :  { %v2057_v54 = vmin.f32 %v2041_v7, 6.0  ;;  %v2059_v1 = vmin.f32 %v2043_v27, 6.0  ;;  %v2085_v42 = vmul.f32 %v2069_v2, %v2005_v61  ;;  %v2087_v57 = vmul.f32 %v2071_v39, %v2007_v47  ;;  %v2733_v17 = vld [vmem:[%s4787_s0 + $0x10] sm:$0xff]  ;;  %v2734_v49 = vld [vmem:[%s4787_s0 + $0x18] sm:$0xff] }
 0x828   :  { %v2086_v23 = vmul.f32 %v2070_v20, %v2006_v12  ;;  %v2088_v9 = vmul.f32 %v2072_v58, %v2008_v36  ;;  %v2058_v52 = vmin.f32 %v2042_v60, 6.0  ;;  %v2060_v26 = vmin.f32 %v2044_v25, 6.0  ;;  %v2731_v36 = vld [vmem:[%s4787_s0] sm:$0xff] }
 0x829   :  { %v2073_v32 = vmul.f32 0.16666667, %v2057_v54  ;;  %v2075_v6 = vmul.f32 0.16666667, %v2059_v1 }
 0x82a   :  { %v2074_v10 = vmul.f32 0.16666667, %v2058_v52  ;;  %v2076_v48 = vmul.f32 0.16666667, %v2060_v26  ;;  %2238 = vmatprep.mubr.f32.mxu1 %v2086_v23  ;;  %2323 = vmatprep.mubr.f32.mxu0 %v2088_v9 }
 0x82b   :  { %2239 = vmatmul.mubr.f32.gmra.mrb[24].mxu1 %v2085_v42  ;;  %2324 = vmatmul.mubr.f32.gmra.mrb[30].mxu0 %v2087_v57  ;;  %v2089_v38 = vmul.f32 %v2073_v32, %v2009_v37  ;;  %v2091_v19 = vmul.f32 %v2075_v6, %v2011_v31 }
 0x82c   :  { %v2090_v8 = vmul.f32 %v2074_v10, %v2010_v43  ;;  %v2092_v3 = vmul.f32 %v2076_v48, %v2012_v24 }
 0x82e   :  { %2243 = vmatprep.mubr.f32.mxu1 %v2090_v8  ;;  %2328 = vmatprep.mubr.f32.mxu0 %v2092_v3 }
 0x82f   :  { %2244 = vmatmul.mubr.f32.gmra.mrb[26].mxu1 %v2089_v38  ;;  %2329 = vmatmul.mubr.f32.gmra.mrb[32].mxu0 %v2091_v19 }
 0x8f2   :  { %v2425_v14 = vpop.f32.mrb[20].mxu1  ;;  %v2469_v41 = vpop.f32.mrb[26].mxu0 }
 0x8f3   :  { %v2426_v35 = vpop.f32.mrb[21].mxu1  ;;  %v2470_v56 = vpop.f32.mrb[27].mxu0 }
 0x8f4   :  { %v2427_v28 = vadd.f32 %v2426_v35, %v2425_v14  ;;  %v2471_v4 = vadd.f32 %v2470_v56, %v2469_v41 }
 0x8f6   :  { %v2231_v53 = vadd.f32 %v2427_v28, %v2382_v13  ;;  %v2428_v46 = vpop.f32.mrb[22].mxu1  ;;  %v2472_v61 = vpop.f32.mrb[28].mxu0 }
 0x8f7   :  { %v2429_v47 = vpop.f32.mrb[23].mxu1  ;;  %v2473_v0 = vpop.f32.mrb[29].mxu0 }
 0x8f8   :  { %v2316_v40 = vadd.f32 %v2471_v4, %v2231_v53  ;;  %v2430_v15 = vadd.f32 %v2429_v47, %v2428_v46  ;;  %v2474_v12 = vadd.f32 %v2473_v0, %v2472_v61 }
 0x8fa   :  { %v2334_v34 = vadd.f32 %v2731_v36, %v2316_v40  ;;  %v2236_v44 = vadd.f32 %v2430_v15, %v2382_v13 }
 0x8fc   :  { %2338 = vst [vmem:[%s4796_s10] sm:$0xff] %v2334_v34  ;;  %v2321_v59 = vadd.f32 %v2474_v12, %v2236_v44 }
 0x8fe   :  { %v2335_v50 = vadd.f32 %v2732_v5, %v2321_v59  ;;  %v2431_v45 = vpop.f32.mrb[24].mxu1  ;;  %v2475_v62 = vpop.f32.mrb[30].mxu0 }
 0x8ff   :  { %v2432_v30 = vpop.f32.mrb[25].mxu1  ;;  %v2476_v22 = vpop.f32.mrb[31].mxu0 }
 0x900   :  { %2339 = vst [vmem:[%s4796_s10 + $0x8] sm:$0xff] %v2335_v50  ;;  %v2433_v11 = vadd.f32 %v2432_v30, %v2431_v45  ;;  %v2477_v37 = vadd.f32 %v2476_v22, %v2475_v62 }
 0x902   :  { %v2241_v31 = vadd.f32 %v2433_v11, %v2382_v13  ;;  %v2434_v18 = vpop.f32.mrb[26].mxu1  ;;  %v2478_v55 = vpop.f32.mrb[32].mxu0 }
 0x903   :  { %v2435_v43 = vpop.f32.mrb[27].mxu1  ;;  %v2479_v24 = vpop.f32.mrb[33].mxu0 }
 0x904   :  { %v2326_v63 = vadd.f32 %v2477_v37, %v2241_v31  ;;  %v2436_v21 = vadd.f32 %v2435_v43, %v2434_v18  ;;  %v2480_v29 = vadd.f32 %v2479_v24, %v2478_v55 }
 0x906   :  { %v2336_v16 = vadd.f32 %v2733_v17, %v2326_v63  ;;  %v2246_v51 = vadd.f32 %v2436_v21, %v2382_v13 }
 0x908   :  { %2340 = vst [vmem:[%s4796_s10 + $0x10] sm:$0xff] %v2336_v16  ;;  %v2331_v33 = vadd.f32 %v2480_v29, %v2246_v51 }
 0x90a   :  { %v2337_v2 = vadd.f32 %v2734_v49, %v2331_v33 }
 0x90c   :  { %2341 = vst [vmem:[%s4796_s10 + $0x18] sm:$0xff] %v2337_v2 }

</bundles_post_ra>
